<compile_context>
chip_gen: v7x
topology: tpu7x:2x2x1
jax: 0.10.0
libtpu: 0.0.40
codegen_flags: <defaults>
</compile_context>

<pallas_src>
import jax
import jax.numpy as jnp
from jax import lax
from jax.experimental import pallas as pl
from jax.experimental.pallas import tpu as pltpu

# ---- model hyper-parameters (small, TPU-friendly) ----
E = 32        # emb_dim
H = 32        # hidden_size (4H = 128 decoder-gate lanes, 8H = 256 fused enc gates)
O = 128       # output_size (decoder classification vocabulary)
V = 16        # len(input_indexer) (shared by input_emb and output_emb)
T_IN = 8      # encoder sequence length
T_OUT = 6     # decoder / gold sequence length

# ---- batching ----
B = 8         # sentences per grid step (fills the 8 sublanes of a vreg)
NG = 2        # sentence groups = grid size ("parallel" -> both TCs on v7x)
N_SENT = NG * B

# ---- packed int32 token slab (per group, [row, 1] layout) ----
XF_R0 = 0                         # forward-time encoder tokens   (T_IN*B rows)
XB_R0 = T_IN * B                  # time-reversed encoder tokens  (T_IN*B rows)
DEC_R0 = 2 * T_IN * B             # teacher-forced decoder inputs (T_OUT*B rows)
Y_R0 = DEC_R0 + T_OUT * B         # gold targets                  (T_OUT*B rows)
TOK_ROWS = 2 * T_IN * B + 2 * T_OUT * B            # 224

# ---- packed bf16 weight slab (width 8H = 256) ----
TAB_ENC_R0 = 0                    # fused enc (emb @ W_ih + b) table  [2V, 8H]
TAB_DEC_R0 = 2 * V                # fused dec (emb @ W_ih + b) table  [V, 4H]
W_CLS_R0 = TAB_DEC_R0 + V         # classifier weight                 [H, O]
BF16_ROWS = W_CLS_R0 + H          # 80

# ---- packed f32 weight slab (width 8H = 256) ----
WHH_ENC_R0 = 0                    # fused block-diag encoder W_hh     [2H, 8H]
WHH_DEC_R0 = 2 * H                # decoder W_hh                      [H, 4H]
W_RED_R0 = WHH_DEC_R0 + H         # block-diag reduce_h_W/reduce_c_W  [4H, 2H] (pad to 4H)
B_RED_R0 = W_RED_R0 + 4 * H       # reduce bias row                   [1, 2H]
B_CLS_R0 = B_RED_R0 + 8           # classifier bias row               [1, O]
F32_ROWS = B_CLS_R0 + 8           # 240


def seq2seq_kernel(tok_ref, wbf_ref, wf32_ref, out_ref, gx_enc_ref, gx_dec_ref):
    bf16 = jnp.bfloat16
    f32 = jnp.float32

    # ---------------- prologue: hoisted (embedding @ W_ih + bias) gate slabs ------
    x_f = tok_ref[XF_R0:XF_R0 + T_IN * B, :]          # [T_IN*B, 1] int32
    x_b = tok_ref[XB_R0:XB_R0 + T_IN * B, :]          # time-reversed copy
    dec = tok_ref[DEC_R0:DEC_R0 + T_OUT * B, :]       # [T_OUT*B, 1]
    ytg = tok_ref[Y_R0:Y_R0 + T_OUT * B, :]           # [T_OUT*B, 1]

    # combined fwd/bwd one-hot: lanes 0:V select the fwd token, V:2V the bwd token
    iota_enc = lax.broadcasted_iota(jnp.int32, (T_IN * B, 2 * V), 1)
    onehot_enc = ((iota_enc == x_f) | (iota_enc == x_b + V)).astype(bf16)
    gx_enc_ref[...] = jnp.dot(
        onehot_enc, wbf_ref[TAB_ENC_R0:TAB_ENC_R0 + 2 * V, :],
        preferred_element_type=f32)                   # [T_IN*B, 8H] (bias included)

    iota_dec = lax.broadcasted_iota(jnp.int32, (T_OUT * B, V), 1)
    onehot_dec = (iota_dec == dec).astype(bf16)
    gx_dec_ref[...] = jnp.dot(
        onehot_dec, wbf_ref[TAB_DEC_R0:TAB_DEC_R0 + V, 0:4 * H],
        preferred_element_type=f32)                   # [T_OUT*B, 4H] (bias included)

    # ---------------- fused bidirectional encoder recurrence ----------------------
    # gate columns are interleaved per direction: [i_f,i_b,f_f,f_b,g_f,g_b,o_f,o_b]
    # so one f32 dot + one sigmoid/tanh pass updates both chains; h/c = [h_f|h_b].
    w_hh_enc = wf32_ref[WHH_ENC_R0:WHH_ENC_R0 + 2 * H, :]        # [2H, 8H] f32
    h = jnp.zeros((B, 2 * H), f32)
    c = jnp.zeros((B, 2 * H), f32)
    for t in range(T_IN):                                         # unrolled
        gates = gx_enc_ref[t * B:(t + 1) * B, :] + jnp.dot(
            h, w_hh_enc, preferred_element_type=f32)              # [B, 8H]
        sig = jax.nn.sigmoid(gates)
        tng = jnp.tanh(gates)
        c = sig[:, 2 * H:4 * H] * c + sig[:, 0:2 * H] * tng[:, 4 * H:6 * H]
        h = sig[:, 6 * H:8 * H] * jnp.tanh(c)

    # ---------------- bridge: reduce_h_W / reduce_c_W as one block-diag matmul ----
    w_red = wf32_ref[W_RED_R0:W_RED_R0 + 4 * H, 0:4 * H]          # [4H, 4H] (cols 2H: zero)
    b_red = wf32_ref[B_RED_R0:B_RED_R0 + 1, 0:4 * H]              # [1, 4H]
    hc_cat = jnp.concatenate([h, c], axis=1)                      # [B, 4H] = [h_f|h_b|c_f|c_b]
    hc = jnp.dot(hc_cat, w_red, preferred_element_type=f32) + b_red
    h = hc[:, 0:H]                                                # decoder h0  [B, H]
    c = hc[:, H:2 * H]                                            # decoder c0  [B, H]

    # ---------------- decoder recurrence (register-resident hidden states) --------
    w_hh_d = wf32_ref[WHH_DEC_R0:WHH_DEC_R0 + H, 0:4 * H]         # [H, 4H] f32
    h_steps = []
    for t in range(T_OUT):                                        # unrolled
        gates = gx_dec_ref[t * B:(t + 1) * B, :] + jnp.dot(
            h, w_hh_d, preferred_element_type=f32)                # [B, 4H]
        sig = jax.nn.sigmoid(gates)
        tng = jnp.tanh(gates)
        c = sig[:, H:2 * H] * c + sig[:, 0:H] * tng[:, 2 * H:3 * H]
        h = sig[:, 3 * H:4 * H] * jnp.tanh(c)
        h_steps.append(h)
    h_all = jnp.concatenate(h_steps, axis=0)                      # [T_OUT*B, H]

    # ---------------- epilogue: classifier + log_softmax + masked NLL -------------
    w_cls = wbf_ref[W_CLS_R0:W_CLS_R0 + H, 0:O]                   # [H, O] bf16
    b_cls = wf32_ref[B_CLS_R0:B_CLS_R0 + 1, 0:O]                  # [1, O] f32
    logits = jnp.dot(h_all.astype(bf16), w_cls,
                     preferred_element_type=f32) + b_cls          # [T_OUT*B, O]
    m = jnp.max(logits, axis=1, keepdims=True)
    lse = jnp.log(jnp.sum(jnp.exp(logits - m), axis=1, keepdims=True)) + m
    log_probs = logits - lse

    sel = lax.broadcasted_iota(jnp.int32, (T_OUT * B, O), 1) == ytg
    logp_tgt = jnp.sum(jnp.where(sel, log_probs, 0.0), axis=1, keepdims=True)
    # NLLLoss(reduction='mean', ignore_index=0) on a batch of one target per step.
    # TODO(synk): PyTorch yields NaN (0/0) when the single target IS the ignore
    # index; here an ignored target contributes 0 to the sentence total instead.
    step_loss = jnp.where(ytg != 0, -logp_tgt, 0.0)               # [T_OUT*B, 1]

    # per-sentence totals: row t*B + b belongs to sentence b (B is a power of 2)
    rows = lax.broadcasted_iota(jnp.int32, (T_OUT * B, B), 0)
    cols = lax.broadcasted_iota(jnp.int32, (T_OUT * B, B), 1)
    sent_sel = ((rows & (B - 1)) == cols).astype(f32)             # [T_OUT*B, B]
    loss_b = jnp.sum(step_loss * sent_sel, axis=0, keepdims=True)  # [1, B]
    out_ref[...] = jnp.broadcast_to(loss_b, (8, B))                # sublane-padded tile


def build_params(key):
    """Deterministic synthetic parameters with the module's shapes (float32)."""
    ks = jax.random.split(key, 18)
    scale = 1.0 / float(jnp.sqrt(H))

    def u(k, shape):
        return jax.random.uniform(k, shape, jnp.float32, -scale, scale)

    return {
        "in_emb":  jax.random.normal(ks[0], (V, E), jnp.float32) * 0.1,
        "out_emb": jax.random.normal(ks[1], (V, E), jnp.float32) * 0.1,
        # encoder LSTM (bidirectional): W_ih^T [E,4H], W_hh^T [H,4H], b_ih+b_hh [1,4H]
        "w_ih_f": u(ks[2], (E, 4 * H)), "w_hh_f": u(ks[3], (H, 4 * H)), "b_f": u(ks[4], (1, 4 * H)),
        "w_ih_b": u(ks[5], (E, 4 * H)), "w_hh_b": u(ks[6], (H, 4 * H)), "b_b": u(ks[7], (1, 4 * H)),
        # reduce_h_W / reduce_c_W : Linear(2H -> H), weights stored transposed
        "w_rh": u(ks[8], (2 * H, H)), "b_rh": u(ks[9], (1, H)),
        "w_rc": u(ks[10], (2 * H, H)), "b_rc": u(ks[11], (1, H)),
        # decoder LSTM
        "w_ih_d": u(ks[12], (E, 4 * H)), "w_hh_d": u(ks[13], (H, 4 * H)), "b_d": u(ks[14], (1, 4 * H)),
        # classification Linear(H -> output_size)
        "w_cls": u(ks[15], (H, O)), "b_cls": u(ks[16], (1, O)),
    }


def _pack_weight_slabs(params):
    """Host-side (parameter-only) fusion + packing into two contiguous slabs."""
    f32 = jnp.float32
    bf16 = jnp.bfloat16

    # fused (embedding -> input-to-hidden gates + bias) tables; encoder gate
    # columns interleaved per direction: [i_f, i_b, f_f, f_b, g_f, g_b, o_f, o_b].
    gf = params["in_emb"] @ params["w_ih_f"] + params["b_f"]       # [V, 4H]
    gb = params["in_emb"] @ params["w_ih_b"] + params["b_b"]       # [V, 4H]
    tab_enc = jnp.zeros((2 * V, 4, 2, H), f32)
    tab_enc = tab_enc.at[:V, :, 0, :].set(gf.reshape(V, 4, H))     # rows 0:V   -> fwd cols
    tab_enc = tab_enc.at[V:, :, 1, :].set(gb.reshape(V, 4, H))     # rows V:2V  -> bwd cols
    tab_enc = tab_enc.reshape(2 * V, 8 * H)

    tab_dec = params["out_emb"] @ params["w_ih_d"] + params["b_d"]  # [V, 4H]

    # block-diagonal encoder W_hh with the same interleaved column layout
    whh = jnp.zeros((2, H, 4, 2, H), f32)
    whh = whh.at[0, :, :, 0, :].set(params["w_hh_f"].reshape(H, 4, H))
    whh = whh.at[1, :, :, 1, :].set(params["w_hh_b"].reshape(H, 4, H))
    w_hh_enc = whh.reshape(2 * H, 8 * H)

    # block-diagonal reduce_h_W / reduce_c_W, zero-padded to 4H columns
    w_red = jnp.zeros((4 * H, 4 * H), f32)
    w_red = w_red.at[:2 * H, :H].set(params["w_rh"])
    w_red = w_red.at[2 * H:, H:2 * H].set(params["w_rc"])
    b_red = jnp.zeros((4 * H,), f32)
    b_red = b_red.at[:H].set(params["b_rh"][0]).at[H:2 * H].set(params["b_rc"][0])

    wbf = jnp.zeros((BF16_ROWS, 8 * H), bf16)
    wbf = wbf.at[TAB_ENC_R0:TAB_ENC_R0 + 2 * V, :].set(tab_enc.astype(bf16))
    wbf = wbf.at[TAB_DEC_R0:TAB_DEC_R0 + V, :4 * H].set(tab_dec.astype(bf16))
    wbf = wbf.at[W_CLS_R0:W_CLS_R0 + H, :O].set(params["w_cls"].astype(bf16))

    wf = jnp.zeros((F32_ROWS, 8 * H), f32)
    wf = wf.at[WHH_ENC_R0:WHH_ENC_R0 + 2 * H, :].set(w_hh_enc)
    wf = wf.at[WHH_DEC_R0:WHH_DEC_R0 + H, :4 * H].set(params["w_hh_d"])
    wf = wf.at[W_RED_R0:W_RED_R0 + 4 * H, :4 * H].set(w_red)
    wf = wf.at[B_RED_R0, :4 * H].set(b_red)
    wf = wf.at[B_CLS_R0, :O].set(params["b_cls"][0])
    return wbf, wf


def _pack_token_slab(x_tok, y_tok):
    """[N_SENT,T] int32 tokens -> one [NG*TOK_ROWS, 1] time-major token slab."""
    x = x_tok.reshape(NG, B, T_IN)
    y = y_tok.reshape(NG, B, T_OUT)
    # teacher forcing: start token 1, then gold tokens shifted right
    dec = jnp.concatenate([jnp.ones((NG, B, 1), jnp.int32), y[:, :, :-1]], axis=2)
    x_fwd = jnp.swapaxes(x, 1, 2).reshape(NG, T_IN * B)            # row = t*B + b
    x_bwd = jnp.swapaxes(x[:, :, ::-1], 1, 2).reshape(NG, T_IN * B)
    dec_tm = jnp.swapaxes(dec, 1, 2).reshape(NG, T_OUT * B)
    y_tm = jnp.swapaxes(y, 1, 2).reshape(NG, T_OUT * B)
    tok = jnp.concatenate([x_fwd, x_bwd, dec_tm, y_tm], axis=1)    # [NG, TOK_ROWS]
    return tok.reshape(NG * TOK_ROWS, 1)


@jax.jit
def seq2seq_forward(params, x_tensor, inp_lens_tensor, y_tensor):
    """Per-sentence teacher-forced total NLL loss, [N_SENT] (== calling the
    module's forward once per sentence)."""
    # TODO(synk): inp_lens is unused — matches pack_padded semantics only for
    # full-length sequences; variable lengths would need masking of the backward
    # encoder chain.  Dropout (p=0.2) is treated as eval-mode identity.
    del inp_lens_tensor
    wbf, wf = _pack_weight_slabs(params)
    tok = _pack_token_slab(x_tensor.astype(jnp.int32), y_tensor.astype(jnp.int32))

    out = pl.pallas_call(
        seq2seq_kernel,
        out_shape=jax.ShapeDtypeStruct((NG * 8, B), jnp.float32),
        grid_spec=pltpu.PrefetchScalarGridSpec(
            num_scalar_prefetch=0,
            grid=(NG,),
            in_specs=[
                pl.BlockSpec((TOK_ROWS, 1), lambda g: (g, 0)),      # per-group tokens
                pl.BlockSpec((BF16_ROWS, 8 * H), lambda g: (0, 0)),  # shared bf16 weights
                pl.BlockSpec((F32_ROWS, 8 * H), lambda g: (0, 0)),   # shared f32 weights
            ],
            out_specs=pl.BlockSpec((8, B), lambda g: (g, 0)),
            scratch_shapes=[
                pltpu.VMEM((T_IN * B, 8 * H), jnp.float32),   # fused encoder input gates
                pltpu.VMEM((T_OUT * B, 4 * H), jnp.float32),  # decoder input gates
            ]),
        compiler_params=pltpu.CompilerParams(
            dimension_semantics=("parallel",)),
    )(tok, wbf, wf)
    # each [8, B] output tile holds the group's per-sentence losses broadcast
    # across the 8 sublane rows; take row 0 of every group.
    return out.reshape(NG, 8, B)[:, 0, :].reshape(N_SENT)


if __name__ == "__main__":
    key = jax.random.PRNGKey(0)
    pkey, xkey, ykey = jax.random.split(key, 3)

    params = build_params(pkey)
    # tokens in [3, V) so they are valid for both the (V-row) output embedding
    # and the O-way classifier, and never the ignore_index 0.
    x_tokens = jax.random.randint(xkey, (N_SENT, T_IN), 3, V, dtype=jnp.int32)
    y_tokens = jax.random.randint(ykey, (N_SENT, T_OUT), 3, V, dtype=jnp.int32)
    inp_lens = jnp.full((N_SENT,), T_IN, dtype=jnp.int32)

    losses = seq2seq_forward(params, x_tokens, inp_lens, y_tokens)
    jax.block_until_ready(losses)
    assert losses.shape == (N_SENT,)
    assert bool(jnp.all(jnp.isfinite(losses))), "loss is not finite"
    print("KERNEL_OK")
</pallas_src>

<mosaic_0001>
module attributes {stable_mosaic.version = 11 : i64} {
  func.func @seq2seq_kernel(%arg0: i32, %arg1: memref<224x1xi32, #tpu.memory_space<vmem>>, %arg2: memref<80x256xbf16, #tpu.memory_space<vmem>>, %arg3: memref<240x256xf32, #tpu.memory_space<vmem>>, %arg4: memref<8x8xf32, #tpu.memory_space<vmem>>, %arg5: memref<64x256xf32, #tpu.memory_space<vmem>>, %arg6: memref<48x128xf32, #tpu.memory_space<vmem>>) attributes {dimension_semantics = [#tpu.dimension_semantics<parallel>], iteration_bounds = array<i64: 2>, scalar_prefetch = 0 : i64, scratch_operands = 2 : i64, tpu.core_type = #tpu.core_type<tc>, window_params = [{transform_indices = @transform_0, window_bounds = array<i64: 224, 1>}, {pipeline_mode = #tpu.pipeline_mode<synchronous>, transform_indices = @transform_1, window_bounds = array<i64: 80, 256>}, {pipeline_mode = #tpu.pipeline_mode<synchronous>, transform_indices = @transform_2, window_bounds = array<i64: 240, 256>}, {transform_indices = @transform_3, window_bounds = array<i64: 8, 8>}]} {
    %c0 = arith.constant 0 : index
    %c0_0 = arith.constant 0 : index
    %0 = vector.load %arg1[%c0, %c0_0] : memref<224x1xi32, #tpu.memory_space<vmem>>, vector<64x1xi32>
    %c64 = arith.constant 64 : index
    %c0_1 = arith.constant 0 : index
    %1 = vector.load %arg1[%c64, %c0_1] : memref<224x1xi32, #tpu.memory_space<vmem>>, vector<64x1xi32>
    %c128 = arith.constant 128 : index
    %c0_2 = arith.constant 0 : index
    %2 = vector.load %arg1[%c128, %c0_2] : memref<224x1xi32, #tpu.memory_space<vmem>>, vector<48x1xi32>
    %c176 = arith.constant 176 : index
    %c0_3 = arith.constant 0 : index
    %3 = vector.load %arg1[%c176, %c0_3] : memref<224x1xi32, #tpu.memory_space<vmem>>, vector<48x1xi32>
    %4 = tpu.iota {dimensions = array<i32: 1>} : vector<64x32xi32>
    %5 = vector.broadcast %0 : vector<64x1xi32> to vector<64x32xi32>
    %6 = arith.cmpi eq, %4, %5 : vector<64x32xi32>
    %c16_i32 = arith.constant 16 : i32
    %7 = vector.broadcast %c16_i32 : i32 to vector<64x1xi32>
    %8 = arith.addi %1, %7 : vector<64x1xi32>
    %9 = vector.broadcast %8 : vector<64x1xi32> to vector<64x32xi32>
    %10 = arith.cmpi eq, %4, %9 : vector<64x32xi32>
    %11 = arith.ori %6, %10 : vector<64x32xi1>
    %12 = arith.extui %11 : vector<64x32xi1> to vector<64x32xi32>
    %13 = arith.sitofp %12 : vector<64x32xi32> to vector<64x32xf32>
    %14 = arith.truncf %13 : vector<64x32xf32> to vector<64x32xbf16>
    %c0_4 = arith.constant 0 : index
    %c0_5 = arith.constant 0 : index
    %15 = vector.load %arg2[%c0_4, %c0_5] : memref<80x256xbf16, #tpu.memory_space<vmem>>, vector<32x256xbf16>
    %cst = arith.constant dense<0.000000e+00> : vector<64x256xf32>
    %16 = tpu.matmul %14, %15, %cst {dimension_numbers = #tpu.dot_dimension_numbers<[1], [0], [0], [1], [0, 0, 1, 1], [], []>} : vector<64x32xbf16>, vector<32x256xbf16>, vector<64x256xf32> -> vector<64x256xf32>
    %c0_6 = arith.constant 0 : index
    %c0_7 = arith.constant 0 : index
    %17 = vector.load %arg5[%c0_6, %c0_7] : memref<64x256xf32, #tpu.memory_space<vmem>>, vector<64x256xf32>
    tpu.vector_store %arg5[%c0_6, %c0_7], %16 {strides = array<i32>} : memref<64x256xf32, #tpu.memory_space<vmem>>, vector<64x256xf32>,
    %18 = tpu.iota {dimensions = array<i32: 1>} : vector<48x16xi32>
    %19 = vector.broadcast %2 : vector<48x1xi32> to vector<48x16xi32>
    %20 = arith.cmpi eq, %18, %19 : vector<48x16xi32>
    %21 = arith.extui %20 : vector<48x16xi1> to vector<48x16xi32>
    %22 = arith.sitofp %21 : vector<48x16xi32> to vector<48x16xf32>
    %23 = arith.truncf %22 : vector<48x16xf32> to vector<48x16xbf16>
    %c32 = arith.constant 32 : index
    %c0_8 = arith.constant 0 : index
    %24 = vector.load %arg2[%c32, %c0_8] : memref<80x256xbf16, #tpu.memory_space<vmem>>, vector<16x128xbf16>
    %cst_9 = arith.constant dense<0.000000e+00> : vector<48x128xf32>
    %25 = tpu.matmul %23, %24, %cst_9 {dimension_numbers = #tpu.dot_dimension_numbers<[1], [0], [0], [1], [0, 0, 1, 1], [], []>} : vector<48x16xbf16>, vector<16x128xbf16>, vector<48x128xf32> -> vector<48x128xf32>
    %c0_10 = arith.constant 0 : index
    %c0_11 = arith.constant 0 : index
    %26 = vector.load %arg6[%c0_10, %c0_11] : memref<48x128xf32, #tpu.memory_space<vmem>>, vector<48x128xf32>
    tpu.vector_store %arg6[%c0_10, %c0_11], %25 {strides = array<i32>} : memref<48x128xf32, #tpu.memory_space<vmem>>, vector<48x128xf32>,
    %c0_12 = arith.constant 0 : index
    %c0_13 = arith.constant 0 : index
    %27 = vector.load %arg3[%c0_12, %c0_13] : memref<240x256xf32, #tpu.memory_space<vmem>>, vector<64x256xf32>
    %cst_14 = arith.constant 0.000000e+00 : f32
    %28 = vector.broadcast %cst_14 : f32 to vector<8x64xf32>
    %cst_15 = arith.constant 0.000000e+00 : f32
    %29 = vector.broadcast %cst_15 : f32 to vector<8x64xf32>
    %c0_16 = arith.constant 0 : index
    %c0_17 = arith.constant 0 : index
    %30 = vector.load %arg5[%c0_16, %c0_17] : memref<64x256xf32, #tpu.memory_space<vmem>>, vector<8x256xf32>
    %cst_18 = arith.constant dense<0.000000e+00> : vector<8x256xf32>
    %31 = tpu.matmul %28, %27, %cst_18 {dimension_numbers = #tpu.dot_dimension_numbers<[1], [0], [0], [1], [0, 0, 1, 1], [], []>} : vector<8x64xf32>, vector<64x256xf32>, vector<8x256xf32> -> vector<8x256xf32>
    %32 = arith.addf %30, %31 : vector<8x256xf32>
    %33 = arith.negf %32 : vector<8x256xf32>
    %34 = math.exp %33 : vector<8x256xf32>
    %cst_19 = arith.constant 1.000000e+00 : f32
    %35 = vector.broadcast %cst_19 : f32 to vector<8x256xf32>
    %36 = arith.addf %35, %34 : vector<8x256xf32>
    %37 = arith.divf %35, %36 : vector<8x256xf32>
    %38 = math.tanh %32 : vector<8x256xf32>
    %39 = vector.extract_strided_slice %37 {offsets = [0, 64], sizes = [8, 64], strides = [1, 1]} : vector<8x256xf32> to vector<8x64xf32>
    %40 = arith.mulf %39, %29 : vector<8x64xf32>
    %41 = vector.extract_strided_slice %37 {offsets = [0, 0], sizes = [8, 64], strides = [1, 1]} : vector<8x256xf32> to vector<8x64xf32>
    %42 = vector.extract_strided_slice %38 {offsets = [0, 128], sizes = [8, 64], strides = [1, 1]} : vector<8x256xf32> to vector<8x64xf32>
    %43 = arith.mulf %41, %42 : vector<8x64xf32>
    %44 = arith.addf %40, %43 : vector<8x64xf32>
    %45 = vector.extract_strided_slice %37 {offsets = [0, 192], sizes = [8, 64], strides = [1, 1]} : vector<8x256xf32> to vector<8x64xf32>
    %46 = math.tanh %44 : vector<8x64xf32>
    %47 = arith.mulf %45, %46 : vector<8x64xf32>
    %c8 = arith.constant 8 : index
    %c0_20 = arith.constant 0 : index
    %48 = vector.load %arg5[%c8, %c0_20] : memref<64x256xf32, #tpu.memory_space<vmem>>, vector<8x256xf32>
    %cst_21 = arith.constant dense<0.000000e+00> : vector<8x256xf32>
    %49 = tpu.matmul %47, %27, %cst_21 {dimension_numbers = #tpu.dot_dimension_numbers<[1], [0], [0], [1], [0, 0, 1, 1], [], []>} : vector<8x64xf32>, vector<64x256xf32>, vector<8x256xf32> -> vector<8x256xf32>
    %50 = arith.addf %48, %49 : vector<8x256xf32>
    %51 = arith.negf %50 : vector<8x256xf32>
    %52 = math.exp %51 : vector<8x256xf32>
    %cst_22 = arith.constant 1.000000e+00 : f32
    %53 = vector.broadcast %cst_22 : f32 to vector<8x256xf32>
    %54 = arith.addf %53, %52 : vector<8x256xf32>
    %55 = arith.divf %53, %54 : vector<8x256xf32>
    %56 = math.tanh %50 : vector<8x256xf32>
    %57 = vector.extract_strided_slice %55 {offsets = [0, 64], sizes = [8, 64], strides = [1, 1]} : vector<8x256xf32> to vector<8x64xf32>
    %58 = arith.mulf %57, %44 : vector<8x64xf32>
    %59 = vector.extract_strided_slice %55 {offsets = [0, 0], sizes = [8, 64], strides = [1, 1]} : vector<8x256xf32> to vector<8x64xf32>
    %60 = vector.extract_strided_slice %56 {offsets = [0, 128], sizes = [8, 64], strides = [1, 1]} : vector<8x256xf32> to vector<8x64xf32>
    %61 = arith.mulf %59, %60 : vector<8x64xf32>
    %62 = arith.addf %58, %61 : vector<8x64xf32>
    %63 = vector.extract_strided_slice %55 {offsets = [0, 192], sizes = [8, 64], strides = [1, 1]} : vector<8x256xf32> to vector<8x64xf32>
    %64 = math.tanh %62 : vector<8x64xf32>
    %65 = arith.mulf %63, %64 : vector<8x64xf32>
    %c16 = arith.constant 16 : index
    %c0_23 = arith.constant 0 : index
    %66 = vector.load %arg5[%c16, %c0_23] : memref<64x256xf32, #tpu.memory_space<vmem>>, vector<8x256xf32>
    %cst_24 = arith.constant dense<0.000000e+00> : vector<8x256xf32>
    %67 = tpu.matmul %65, %27, %cst_24 {dimension_numbers = #tpu.dot_dimension_numbers<[1], [0], [0], [1], [0, 0, 1, 1], [], []>} : vector<8x64xf32>, vector<64x256xf32>, vector<8x256xf32> -> vector<8x256xf32>
    %68 = arith.addf %66, %67 : vector<8x256xf32>
    %69 = arith.negf %68 : vector<8x256xf32>
    %70 = math.exp %69 : vector<8x256xf32>
    %cst_25 = arith.constant 1.000000e+00 : f32
    %71 = vector.broadcast %cst_25 : f32 to vector<8x256xf32>
    %72 = arith.addf %71, %70 : vector<8x256xf32>
    %73 = arith.divf %71, %72 : vector<8x256xf32>
    %74 = math.tanh %68 : vector<8x256xf32>
    %75 = vector.extract_strided_slice %73 {offsets = [0, 64], sizes = [8, 64], strides = [1, 1]} : vector<8x256xf32> to vector<8x64xf32>
    %76 = arith.mulf %75, %62 : vector<8x64xf32>
    %77 = vector.extract_strided_slice %73 {offsets = [0, 0], sizes = [8, 64], strides = [1, 1]} : vector<8x256xf32> to vector<8x64xf32>
    %78 = vector.extract_strided_slice %74 {offsets = [0, 128], sizes = [8, 64], strides = [1, 1]} : vector<8x256xf32> to vector<8x64xf32>
    %79 = arith.mulf %77, %78 : vector<8x64xf32>
    %80 = arith.addf %76, %79 : vector<8x64xf32>
    %81 = vector.extract_strided_slice %73 {offsets = [0, 192], sizes = [8, 64], strides = [1, 1]} : vector<8x256xf32> to vector<8x64xf32>
    %82 = math.tanh %80 : vector<8x64xf32>
    %83 = arith.mulf %81, %82 : vector<8x64xf32>
    %c24 = arith.constant 24 : index
    %c0_26 = arith.constant 0 : index
    %84 = vector.load %arg5[%c24, %c0_26] : memref<64x256xf32, #tpu.memory_space<vmem>>, vector<8x256xf32>
    %cst_27 = arith.constant dense<0.000000e+00> : vector<8x256xf32>
    %85 = tpu.matmul %83, %27, %cst_27 {dimension_numbers = #tpu.dot_dimension_numbers<[1], [0], [0], [1], [0, 0, 1, 1], [], []>} : vector<8x64xf32>, vector<64x256xf32>, vector<8x256xf32> -> vector<8x256xf32>
    %86 = arith.addf %84, %85 : vector<8x256xf32>
    %87 = arith.negf %86 : vector<8x256xf32>
    %88 = math.exp %87 : vector<8x256xf32>
    %cst_28 = arith.constant 1.000000e+00 : f32
    %89 = vector.broadcast %cst_28 : f32 to vector<8x256xf32>
    %90 = arith.addf %89, %88 : vector<8x256xf32>
    %91 = arith.divf %89, %90 : vector<8x256xf32>
    %92 = math.tanh %86 : vector<8x256xf32>
    %93 = vector.extract_strided_slice %91 {offsets = [0, 64], sizes = [8, 64], strides = [1, 1]} : vector<8x256xf32> to vector<8x64xf32>
    %94 = arith.mulf %93, %80 : vector<8x64xf32>
    %95 = vector.extract_strided_slice %91 {offsets = [0, 0], sizes = [8, 64], strides = [1, 1]} : vector<8x256xf32> to vector<8x64xf32>
    %96 = vector.extract_strided_slice %92 {offsets = [0, 128], sizes = [8, 64], strides = [1, 1]} : vector<8x256xf32> to vector<8x64xf32>
    %97 = arith.mulf %95, %96 : vector<8x64xf32>
    %98 = arith.addf %94, %97 : vector<8x64xf32>
    %99 = vector.extract_strided_slice %91 {offsets = [0, 192], sizes = [8, 64], strides = [1, 1]} : vector<8x256xf32> to vector<8x64xf32>
    %100 = math.tanh %98 : vector<8x64xf32>
    %101 = arith.mulf %99, %100 : vector<8x64xf32>
    %c32_29 = arith.constant 32 : index
    %c0_30 = arith.constant 0 : index
    %102 = vector.load %arg5[%c32_29, %c0_30] : memref<64x256xf32, #tpu.memory_space<vmem>>, vector<8x256xf32>
    %cst_31 = arith.constant dense<0.000000e+00> : vector<8x256xf32>
    %103 = tpu.matmul %101, %27, %cst_31 {dimension_numbers = #tpu.dot_dimension_numbers<[1], [0], [0], [1], [0, 0, 1, 1], [], []>} : vector<8x64xf32>, vector<64x256xf32>, vector<8x256xf32> -> vector<8x256xf32>
    %104 = arith.addf %102, %103 : vector<8x256xf32>
    %105 = arith.negf %104 : vector<8x256xf32>
    %106 = math.exp %105 : vector<8x256xf32>
    %cst_32 = arith.constant 1.000000e+00 : f32
    %107 = vector.broadcast %cst_32 : f32 to vector<8x256xf32>
    %108 = arith.addf %107, %106 : vector<8x256xf32>
    %109 = arith.divf %107, %108 : vector<8x256xf32>
    %110 = math.tanh %104 : vector<8x256xf32>
    %111 = vector.extract_strided_slice %109 {offsets = [0, 64], sizes = [8, 64], strides = [1, 1]} : vector<8x256xf32> to vector<8x64xf32>
    %112 = arith.mulf %111, %98 : vector<8x64xf32>
    %113 = vector.extract_strided_slice %109 {offsets = [0, 0], sizes = [8, 64], strides = [1, 1]} : vector<8x256xf32> to vector<8x64xf32>
    %114 = vector.extract_strided_slice %110 {offsets = [0, 128], sizes = [8, 64], strides = [1, 1]} : vector<8x256xf32> to vector<8x64xf32>
    %115 = arith.mulf %113, %114 : vector<8x64xf32>
    %116 = arith.addf %112, %115 : vector<8x64xf32>
    %117 = vector.extract_strided_slice %109 {offsets = [0, 192], sizes = [8, 64], strides = [1, 1]} : vector<8x256xf32> to vector<8x64xf32>
    %118 = math.tanh %116 : vector<8x64xf32>
    %119 = arith.mulf %117, %118 : vector<8x64xf32>
    %c40 = arith.constant 40 : index
    %c0_33 = arith.constant 0 : index
    %120 = vector.load %arg5[%c40, %c0_33] : memref<64x256xf32, #tpu.memory_space<vmem>>, vector<8x256xf32>
    %cst_34 = arith.constant dense<0.000000e+00> : vector<8x256xf32>
    %121 = tpu.matmul %119, %27, %cst_34 {dimension_numbers = #tpu.dot_dimension_numbers<[1], [0], [0], [1], [0, 0, 1, 1], [], []>} : vector<8x64xf32>, vector<64x256xf32>, vector<8x256xf32> -> vector<8x256xf32>
    %122 = arith.addf %120, %121 : vector<8x256xf32>
    %123 = arith.negf %122 : vector<8x256xf32>
    %124 = math.exp %123 : vector<8x256xf32>
    %cst_35 = arith.constant 1.000000e+00 : f32
    %125 = vector.broadcast %cst_35 : f32 to vector<8x256xf32>
    %126 = arith.addf %125, %124 : vector<8x256xf32>
    %127 = arith.divf %125, %126 : vector<8x256xf32>
    %128 = math.tanh %122 : vector<8x256xf32>
    %129 = vector.extract_strided_slice %127 {offsets = [0, 64], sizes = [8, 64], strides = [1, 1]} : vector<8x256xf32> to vector<8x64xf32>
    %130 = arith.mulf %129, %116 : vector<8x64xf32>
    %131 = vector.extract_strided_slice %127 {offsets = [0, 0], sizes = [8, 64], strides = [1, 1]} : vector<8x256xf32> to vector<8x64xf32>
    %132 = vector.extract_strided_slice %128 {offsets = [0, 128], sizes = [8, 64], strides = [1, 1]} : vector<8x256xf32> to vector<8x64xf32>
    %133 = arith.mulf %131, %132 : vector<8x64xf32>
    %134 = arith.addf %130, %133 : vector<8x64xf32>
    %135 = vector.extract_strided_slice %127 {offsets = [0, 192], sizes = [8, 64], strides = [1, 1]} : vector<8x256xf32> to vector<8x64xf32>
    %136 = math.tanh %134 : vector<8x64xf32>
    %137 = arith.mulf %135, %136 : vector<8x64xf32>
    %c48 = arith.constant 48 : index
    %c0_36 = arith.constant 0 : index
    %138 = vector.load %arg5[%c48, %c0_36] : memref<64x256xf32, #tpu.memory_space<vmem>>, vector<8x256xf32>
    %cst_37 = arith.constant dense<0.000000e+00> : vector<8x256xf32>
    %139 = tpu.matmul %137, %27, %cst_37 {dimension_numbers = #tpu.dot_dimension_numbers<[1], [0], [0], [1], [0, 0, 1, 1], [], []>} : vector<8x64xf32>, vector<64x256xf32>, vector<8x256xf32> -> vector<8x256xf32>
    %140 = arith.addf %138, %139 : vector<8x256xf32>
    %141 = arith.negf %140 : vector<8x256xf32>
    %142 = math.exp %141 : vector<8x256xf32>
    %cst_38 = arith.constant 1.000000e+00 : f32
    %143 = vector.broadcast %cst_38 : f32 to vector<8x256xf32>
    %144 = arith.addf %143, %142 : vector<8x256xf32>
    %145 = arith.divf %143, %144 : vector<8x256xf32>
    %146 = math.tanh %140 : vector<8x256xf32>
    %147 = vector.extract_strided_slice %145 {offsets = [0, 64], sizes = [8, 64], strides = [1, 1]} : vector<8x256xf32> to vector<8x64xf32>
    %148 = arith.mulf %147, %134 : vector<8x64xf32>
    %149 = vector.extract_strided_slice %145 {offsets = [0, 0], sizes = [8, 64], strides = [1, 1]} : vector<8x256xf32> to vector<8x64xf32>
    %150 = vector.extract_strided_slice %146 {offsets = [0, 128], sizes = [8, 64], strides = [1, 1]} : vector<8x256xf32> to vector<8x64xf32>
    %151 = arith.mulf %149, %150 : vector<8x64xf32>
    %152 = arith.addf %148, %151 : vector<8x64xf32>
    %153 = vector.extract_strided_slice %145 {offsets = [0, 192], sizes = [8, 64], strides = [1, 1]} : vector<8x256xf32> to vector<8x64xf32>
    %154 = math.tanh %152 : vector<8x64xf32>
    %155 = arith.mulf %153, %154 : vector<8x64xf32>
    %c56 = arith.constant 56 : index
    %c0_39 = arith.constant 0 : index
    %156 = vector.load %arg5[%c56, %c0_39] : memref<64x256xf32, #tpu.memory_space<vmem>>, vector<8x256xf32>
    %cst_40 = arith.constant dense<0.000000e+00> : vector<8x256xf32>
    %157 = tpu.matmul %155, %27, %cst_40 {dimension_numbers = #tpu.dot_dimension_numbers<[1], [0], [0], [1], [0, 0, 1, 1], [], []>} : vector<8x64xf32>, vector<64x256xf32>, vector<8x256xf32> -> vector<8x256xf32>
    %158 = arith.addf %156, %157 : vector<8x256xf32>
    %159 = arith.negf %158 : vector<8x256xf32>
    %160 = math.exp %159 : vector<8x256xf32>
    %cst_41 = arith.constant 1.000000e+00 : f32
    %161 = vector.broadcast %cst_41 : f32 to vector<8x256xf32>
    %162 = arith.addf %161, %160 : vector<8x256xf32>
    %163 = arith.divf %161, %162 : vector<8x256xf32>
    %164 = math.tanh %158 : vector<8x256xf32>
    %165 = vector.extract_strided_slice %163 {offsets = [0, 64], sizes = [8, 64], strides = [1, 1]} : vector<8x256xf32> to vector<8x64xf32>
    %166 = arith.mulf %165, %152 : vector<8x64xf32>
    %167 = vector.extract_strided_slice %163 {offsets = [0, 0], sizes = [8, 64], strides = [1, 1]} : vector<8x256xf32> to vector<8x64xf32>
    %168 = vector.extract_strided_slice %164 {offsets = [0, 128], sizes = [8, 64], strides = [1, 1]} : vector<8x256xf32> to vector<8x64xf32>
    %169 = arith.mulf %167, %168 : vector<8x64xf32>
    %170 = arith.addf %166, %169 : vector<8x64xf32>
    %171 = vector.extract_strided_slice %163 {offsets = [0, 192], sizes = [8, 64], strides = [1, 1]} : vector<8x256xf32> to vector<8x64xf32>
    %172 = math.tanh %170 : vector<8x64xf32>
    %173 = arith.mulf %171, %172 : vector<8x64xf32>
    %c96 = arith.constant 96 : index
    %c0_42 = arith.constant 0 : index
    %174 = vector.load %arg3[%c96, %c0_42] : memref<240x256xf32, #tpu.memory_space<vmem>>, vector<128x128xf32>
    %c224 = arith.constant 224 : index
    %c0_43 = arith.constant 0 : index
    %175 = vector.load %arg3[%c224, %c0_43] : memref<240x256xf32, #tpu.memory_space<vmem>>, vector<1x128xf32>
    %176 = tpu.concatenate %173, %170 in 1 : vector<8x64xf32>, vector<8x64xf32> -> vector<8x128xf32>
    %cst_44 = arith.constant dense<0.000000e+00> : vector<8x128xf32>
    %177 = tpu.matmul %176, %174, %cst_44 {dimension_numbers = #tpu.dot_dimension_numbers<[1], [0], [0], [1], [0, 0, 1, 1], [], []>} : vector<8x128xf32>, vector<128x128xf32>, vector<8x128xf32> -> vector<8x128xf32>
    %178 = vector.broadcast %175 : vector<1x128xf32> to vector<8x128xf32>
    %179 = arith.addf %177, %178 : vector<8x128xf32>
    %180 = vector.extract_strided_slice %179 {offsets = [0, 0], sizes = [8, 32], strides = [1, 1]} : vector<8x128xf32> to vector<8x32xf32>
    %181 = vector.extract_strided_slice %179 {offsets = [0, 32], sizes = [8, 32], strides = [1, 1]} : vector<8x128xf32> to vector<8x32xf32>
    %c64_45 = arith.constant 64 : index
    %c0_46 = arith.constant 0 : index
    %182 = vector.load %arg3[%c64_45, %c0_46] : memref<240x256xf32, #tpu.memory_space<vmem>>, vector<32x128xf32>
    %c0_47 = arith.constant 0 : index
    %c0_48 = arith.constant 0 : index
    %183 = vector.load %arg6[%c0_47, %c0_48] : memref<48x128xf32, #tpu.memory_space<vmem>>, vector<8x128xf32>
    %cst_49 = arith.constant dense<0.000000e+00> : vector<8x128xf32>
    %184 = tpu.matmul %180, %182, %cst_49 {dimension_numbers = #tpu.dot_dimension_numbers<[1], [0], [0], [1], [0, 0, 1, 1], [], []>} : vector<8x32xf32>, vector<32x128xf32>, vector<8x128xf32> -> vector<8x128xf32>
    %185 = arith.addf %183, %184 : vector<8x128xf32>
    %186 = arith.negf %185 : vector<8x128xf32>
    %187 = math.exp %186 : vector<8x128xf32>
    %cst_50 = arith.constant 1.000000e+00 : f32
    %188 = vector.broadcast %cst_50 : f32 to vector<8x128xf32>
    %189 = arith.addf %188, %187 : vector<8x128xf32>
    %190 = arith.divf %188, %189 : vector<8x128xf32>
    %191 = math.tanh %185 : vector<8x128xf32>
    %192 = vector.extract_strided_slice %190 {offsets = [0, 32], sizes = [8, 32], strides = [1, 1]} : vector<8x128xf32> to vector<8x32xf32>
    %193 = arith.mulf %192, %181 : vector<8x32xf32>
    %194 = vector.extract_strided_slice %190 {offsets = [0, 0], sizes = [8, 32], strides = [1, 1]} : vector<8x128xf32> to vector<8x32xf32>
    %195 = vector.extract_strided_slice %191 {offsets = [0, 64], sizes = [8, 32], strides = [1, 1]} : vector<8x128xf32> to vector<8x32xf32>
    %196 = arith.mulf %194, %195 : vector<8x32xf32>
    %197 = arith.addf %193, %196 : vector<8x32xf32>
    %198 = vector.extract_strided_slice %190 {offsets = [0, 96], sizes = [8, 32], strides = [1, 1]} : vector<8x128xf32> to vector<8x32xf32>
    %199 = math.tanh %197 : vector<8x32xf32>
    %200 = arith.mulf %198, %199 : vector<8x32xf32>
    %c8_51 = arith.constant 8 : index
    %c0_52 = arith.constant 0 : index
    %201 = vector.load %arg6[%c8_51, %c0_52] : memref<48x128xf32, #tpu.memory_space<vmem>>, vector<8x128xf32>
    %cst_53 = arith.constant dense<0.000000e+00> : vector<8x128xf32>
    %202 = tpu.matmul %200, %182, %cst_53 {dimension_numbers = #tpu.dot_dimension_numbers<[1], [0], [0], [1], [0, 0, 1, 1], [], []>} : vector<8x32xf32>, vector<32x128xf32>, vector<8x128xf32> -> vector<8x128xf32>
    %203 = arith.addf %201, %202 : vector<8x128xf32>
    %204 = arith.negf %203 : vector<8x128xf32>
    %205 = math.exp %204 : vector<8x128xf32>
    %cst_54 = arith.constant 1.000000e+00 : f32
    %206 = vector.broadcast %cst_54 : f32 to vector<8x128xf32>
    %207 = arith.addf %206, %205 : vector<8x128xf32>
    %208 = arith.divf %206, %207 : vector<8x128xf32>
    %209 = math.tanh %203 : vector<8x128xf32>
    %210 = vector.extract_strided_slice %208 {offsets = [0, 32], sizes = [8, 32], strides = [1, 1]} : vector<8x128xf32> to vector<8x32xf32>
    %211 = arith.mulf %210, %197 : vector<8x32xf32>
    %212 = vector.extract_strided_slice %208 {offsets = [0, 0], sizes = [8, 32], strides = [1, 1]} : vector<8x128xf32> to vector<8x32xf32>
    %213 = vector.extract_strided_slice %209 {offsets = [0, 64], sizes = [8, 32], strides = [1, 1]} : vector<8x128xf32> to vector<8x32xf32>
    %214 = arith.mulf %212, %213 : vector<8x32xf32>
    %215 = arith.addf %211, %214 : vector<8x32xf32>
    %216 = vector.extract_strided_slice %208 {offsets = [0, 96], sizes = [8, 32], strides = [1, 1]} : vector<8x128xf32> to vector<8x32xf32>
    %217 = math.tanh %215 : vector<8x32xf32>
    %218 = arith.mulf %216, %217 : vector<8x32xf32>
    %c16_55 = arith.constant 16 : index
    %c0_56 = arith.constant 0 : index
    %219 = vector.load %arg6[%c16_55, %c0_56] : memref<48x128xf32, #tpu.memory_space<vmem>>, vector<8x128xf32>
    %cst_57 = arith.constant dense<0.000000e+00> : vector<8x128xf32>
    %220 = tpu.matmul %218, %182, %cst_57 {dimension_numbers = #tpu.dot_dimension_numbers<[1], [0], [0], [1], [0, 0, 1, 1], [], []>} : vector<8x32xf32>, vector<32x128xf32>, vector<8x128xf32> -> vector<8x128xf32>
    %221 = arith.addf %219, %220 : vector<8x128xf32>
    %222 = arith.negf %221 : vector<8x128xf32>
    %223 = math.exp %222 : vector<8x128xf32>
    %cst_58 = arith.constant 1.000000e+00 : f32
    %224 = vector.broadcast %cst_58 : f32 to vector<8x128xf32>
    %225 = arith.addf %224, %223 : vector<8x128xf32>
    %226 = arith.divf %224, %225 : vector<8x128xf32>
    %227 = math.tanh %221 : vector<8x128xf32>
    %228 = vector.extract_strided_slice %226 {offsets = [0, 32], sizes = [8, 32], strides = [1, 1]} : vector<8x128xf32> to vector<8x32xf32>
    %229 = arith.mulf %228, %215 : vector<8x32xf32>
    %230 = vector.extract_strided_slice %226 {offsets = [0, 0], sizes = [8, 32], strides = [1, 1]} : vector<8x128xf32> to vector<8x32xf32>
    %231 = vector.extract_strided_slice %227 {offsets = [0, 64], sizes = [8, 32], strides = [1, 1]} : vector<8x128xf32> to vector<8x32xf32>
    %232 = arith.mulf %230, %231 : vector<8x32xf32>
    %233 = arith.addf %229, %232 : vector<8x32xf32>
    %234 = vector.extract_strided_slice %226 {offsets = [0, 96], sizes = [8, 32], strides = [1, 1]} : vector<8x128xf32> to vector<8x32xf32>
    %235 = math.tanh %233 : vector<8x32xf32>
    %236 = arith.mulf %234, %235 : vector<8x32xf32>
    %c24_59 = arith.constant 24 : index
    %c0_60 = arith.constant 0 : index
    %237 = vector.load %arg6[%c24_59, %c0_60] : memref<48x128xf32, #tpu.memory_space<vmem>>, vector<8x128xf32>
    %cst_61 = arith.constant dense<0.000000e+00> : vector<8x128xf32>
    %238 = tpu.matmul %236, %182, %cst_61 {dimension_numbers = #tpu.dot_dimension_numbers<[1], [0], [0], [1], [0, 0, 1, 1], [], []>} : vector<8x32xf32>, vector<32x128xf32>, vector<8x128xf32> -> vector<8x128xf32>
    %239 = arith.addf %237, %238 : vector<8x128xf32>
    %240 = arith.negf %239 : vector<8x128xf32>
    %241 = math.exp %240 : vector<8x128xf32>
    %cst_62 = arith.constant 1.000000e+00 : f32
    %242 = vector.broadcast %cst_62 : f32 to vector<8x128xf32>
    %243 = arith.addf %242, %241 : vector<8x128xf32>
    %244 = arith.divf %242, %243 : vector<8x128xf32>
    %245 = math.tanh %239 : vector<8x128xf32>
    %246 = vector.extract_strided_slice %244 {offsets = [0, 32], sizes = [8, 32], strides = [1, 1]} : vector<8x128xf32> to vector<8x32xf32>
    %247 = arith.mulf %246, %233 : vector<8x32xf32>
    %248 = vector.extract_strided_slice %244 {offsets = [0, 0], sizes = [8, 32], strides = [1, 1]} : vector<8x128xf32> to vector<8x32xf32>
    %249 = vector.extract_strided_slice %245 {offsets = [0, 64], sizes = [8, 32], strides = [1, 1]} : vector<8x128xf32> to vector<8x32xf32>
    %250 = arith.mulf %248, %249 : vector<8x32xf32>
    %251 = arith.addf %247, %250 : vector<8x32xf32>
    %252 = vector.extract_strided_slice %244 {offsets = [0, 96], sizes = [8, 32], strides = [1, 1]} : vector<8x128xf32> to vector<8x32xf32>
    %253 = math.tanh %251 : vector<8x32xf32>
    %254 = arith.mulf %252, %253 : vector<8x32xf32>
    %c32_63 = arith.constant 32 : index
    %c0_64 = arith.constant 0 : index
    %255 = vector.load %arg6[%c32_63, %c0_64] : memref<48x128xf32, #tpu.memory_space<vmem>>, vector<8x128xf32>
    %cst_65 = arith.constant dense<0.000000e+00> : vector<8x128xf32>
    %256 = tpu.matmul %254, %182, %cst_65 {dimension_numbers = #tpu.dot_dimension_numbers<[1], [0], [0], [1], [0, 0, 1, 1], [], []>} : vector<8x32xf32>, vector<32x128xf32>, vector<8x128xf32> -> vector<8x128xf32>
    %257 = arith.addf %255, %256 : vector<8x128xf32>
    %258 = arith.negf %257 : vector<8x128xf32>
    %259 = math.exp %258 : vector<8x128xf32>
    %cst_66 = arith.constant 1.000000e+00 : f32
    %260 = vector.broadcast %cst_66 : f32 to vector<8x128xf32>
    %261 = arith.addf %260, %259 : vector<8x128xf32>
    %262 = arith.divf %260, %261 : vector<8x128xf32>
    %263 = math.tanh %257 : vector<8x128xf32>
    %264 = vector.extract_strided_slice %262 {offsets = [0, 32], sizes = [8, 32], strides = [1, 1]} : vector<8x128xf32> to vector<8x32xf32>
    %265 = arith.mulf %264, %251 : vector<8x32xf32>
    %266 = vector.extract_strided_slice %262 {offsets = [0, 0], sizes = [8, 32], strides = [1, 1]} : vector<8x128xf32> to vector<8x32xf32>
    %267 = vector.extract_strided_slice %263 {offsets = [0, 64], sizes = [8, 32], strides = [1, 1]} : vector<8x128xf32> to vector<8x32xf32>
    %268 = arith.mulf %266, %267 : vector<8x32xf32>
    %269 = arith.addf %265, %268 : vector<8x32xf32>
    %270 = vector.extract_strided_slice %262 {offsets = [0, 96], sizes = [8, 32], strides = [1, 1]} : vector<8x128xf32> to vector<8x32xf32>
    %271 = math.tanh %269 : vector<8x32xf32>
    %272 = arith.mulf %270, %271 : vector<8x32xf32>
    %c40_67 = arith.constant 40 : index
    %c0_68 = arith.constant 0 : index
    %273 = vector.load %arg6[%c40_67, %c0_68] : memref<48x128xf32, #tpu.memory_space<vmem>>, vector<8x128xf32>
    %cst_69 = arith.constant dense<0.000000e+00> : vector<8x128xf32>
    %274 = tpu.matmul %272, %182, %cst_69 {dimension_numbers = #tpu.dot_dimension_numbers<[1], [0], [0], [1], [0, 0, 1, 1], [], []>} : vector<8x32xf32>, vector<32x128xf32>, vector<8x128xf32> -> vector<8x128xf32>
    %275 = arith.addf %273, %274 : vector<8x128xf32>
    %276 = arith.negf %275 : vector<8x128xf32>
    %277 = math.exp %276 : vector<8x128xf32>
    %cst_70 = arith.constant 1.000000e+00 : f32
    %278 = vector.broadcast %cst_70 : f32 to vector<8x128xf32>
    %279 = arith.addf %278, %277 : vector<8x128xf32>
    %280 = arith.divf %278, %279 : vector<8x128xf32>
    %281 = math.tanh %275 : vector<8x128xf32>
    %282 = vector.extract_strided_slice %280 {offsets = [0, 32], sizes = [8, 32], strides = [1, 1]} : vector<8x128xf32> to vector<8x32xf32>
    %283 = arith.mulf %282, %269 : vector<8x32xf32>
    %284 = vector.extract_strided_slice %280 {offsets = [0, 0], sizes = [8, 32], strides = [1, 1]} : vector<8x128xf32> to vector<8x32xf32>
    %285 = vector.extract_strided_slice %281 {offsets = [0, 64], sizes = [8, 32], strides = [1, 1]} : vector<8x128xf32> to vector<8x32xf32>
    %286 = arith.mulf %284, %285 : vector<8x32xf32>
    %287 = arith.addf %283, %286 : vector<8x32xf32>
    %288 = vector.extract_strided_slice %280 {offsets = [0, 96], sizes = [8, 32], strides = [1, 1]} : vector<8x128xf32> to vector<8x32xf32>
    %289 = math.tanh %287 : vector<8x32xf32>
    %290 = arith.mulf %288, %289 : vector<8x32xf32>
    %291 = tpu.concatenate %200, %218, %236, %254, %272, %290 in 0 : vector<8x32xf32>, vector<8x32xf32>, vector<8x32xf32>, vector<8x32xf32>, vector<8x32xf32>, vector<8x32xf32> -> vector<48x32xf32>
    %c48_71 = arith.constant 48 : index
    %c0_72 = arith.constant 0 : index
    %292 = vector.load %arg2[%c48_71, %c0_72] : memref<80x256xbf16, #tpu.memory_space<vmem>>, vector<32x128xbf16>
    %c232 = arith.constant 232 : index
    %c0_73 = arith.constant 0 : index
    %293 = vector.load %arg3[%c232, %c0_73] : memref<240x256xf32, #tpu.memory_space<vmem>>, vector<1x128xf32>
    %294 = arith.truncf %291 : vector<48x32xf32> to vector<48x32xbf16>
    %cst_74 = arith.constant dense<0.000000e+00> : vector<48x128xf32>
    %295 = tpu.matmul %294, %292, %cst_74 {dimension_numbers = #tpu.dot_dimension_numbers<[1], [0], [0], [1], [0, 0, 1, 1], [], []>} : vector<48x32xbf16>, vector<32x128xbf16>, vector<48x128xf32> -> vector<48x128xf32>
    %296 = vector.broadcast %293 : vector<1x128xf32> to vector<48x128xf32>
    %297 = arith.addf %295, %296 : vector<48x128xf32>
    %cst_75 = arith.constant dense<0xFF800000> : vector<48xf32>
    %298 = vector.multi_reduction <maximumf>, %297, %cst_75 [1] : vector<48x128xf32> to vector<48xf32>
    %299 = vector.shape_cast %298 : vector<48xf32> to vector<48x1xf32>
    %300 = vector.broadcast %299 : vector<48x1xf32> to vector<48x128xf32>
    %301 = arith.subf %297, %300 : vector<48x128xf32>
    %302 = math.exp %301 : vector<48x128xf32>
    %cst_76 = arith.constant dense<0.000000e+00> : vector<48xf32>
    %303 = vector.multi_reduction <add>, %302, %cst_76 [1] : vector<48x128xf32> to vector<48xf32>
    %304 = vector.shape_cast %303 : vector<48xf32> to vector<48x1xf32>
    %305 = math.log %304 : vector<48x1xf32>
    %306 = arith.addf %305, %299 : vector<48x1xf32>
    %307 = vector.broadcast %306 : vector<48x1xf32> to vector<48x128xf32>
    %308 = arith.subf %297, %307 : vector<48x128xf32>
    %309 = tpu.iota {dimensions = array<i32: 1>} : vector<48x128xi32>
    %310 = vector.broadcast %3 : vector<48x1xi32> to vector<48x128xi32>
    %311 = arith.cmpi eq, %309, %310 : vector<48x128xi32>
    %cst_77 = arith.constant 0.000000e+00 : f32
    %312 = vector.broadcast %cst_77 : f32 to vector<48x128xf32>
    %313 = arith.select %311, %308, %312 : vector<48x128xi1>, vector<48x128xf32>
    %cst_78 = arith.constant dense<0.000000e+00> : vector<48xf32>
    %314 = vector.multi_reduction <add>, %313, %cst_78 [1] : vector<48x128xf32> to vector<48xf32>
    %315 = vector.shape_cast %314 : vector<48xf32> to vector<48x1xf32>
    %c0_i32 = arith.constant 0 : i32
    %316 = vector.broadcast %c0_i32 : i32 to vector<48x1xi32>
    %317 = arith.cmpi ne, %3, %316 : vector<48x1xi32>
    %cst_79 = arith.constant 0.000000e+00 : f32
    %318 = vector.broadcast %cst_79 : f32 to vector<48x1xf32>
    %319 = arith.subf %318, %315 : vector<48x1xf32>
    %cst_80 = arith.constant 0.000000e+00 : f32
    %320 = vector.broadcast %cst_80 : f32 to vector<48x1xf32>
    %321 = arith.select %317, %319, %320 : vector<48x1xi1>, vector<48x1xf32>
    %322 = tpu.iota {dimensions = array<i32: 0>} : vector<48x8xi32>
    %323 = tpu.iota {dimensions = array<i32: 1>} : vector<48x8xi32>
    %c7_i32 = arith.constant 7 : i32
    %324 = vector.broadcast %c7_i32 : i32 to vector<48x8xi32>
    %325 = arith.andi %322, %324 : vector<48x8xi32>
    %326 = arith.cmpi eq, %325, %323 : vector<48x8xi32>
    %327 = arith.extui %326 : vector<48x8xi1> to vector<48x8xi32>
    %328 = arith.sitofp %327 : vector<48x8xi32> to vector<48x8xf32>
    %329 = vector.broadcast %321 : vector<48x1xf32> to vector<48x8xf32>
    %330 = arith.mulf %329, %328 : vector<48x8xf32>
    %cst_81 = arith.constant dense<0.000000e+00> : vector<8xf32>
    %331 = vector.multi_reduction <add>, %330, %cst_81 [0] : vector<48x8xf32> to vector<8xf32>
    %332 = vector.shape_cast %331 : vector<8xf32> to vector<1x8xf32>
    %333 = vector.shape_cast %332 : vector<1x8xf32> to vector<1x8xf32>
    %334 = vector.broadcast %333 : vector<1x8xf32> to vector<8x8xf32>
    %c0_82 = arith.constant 0 : index
    %c0_83 = arith.constant 0 : index
    %335 = vector.load %arg4[%c0_82, %c0_83] : memref<8x8xf32, #tpu.memory_space<vmem>>, vector<8x8xf32>
    tpu.vector_store %arg4[%c0_82, %c0_83], %334 {strides = array<i32>} : memref<8x8xf32, #tpu.memory_space<vmem>>, vector<8x8xf32>,
    return
  }
  func.func @transform_0(%arg0: i32) -> (i32, i32) {
    %c0_i32 = arith.constant 0 : i32
    %c0_i32_0 = arith.constant 0 : i32
    return %arg0, %c0_i32 : i32, i32
  }
  func.func @transform_1(%arg0: i32) -> (i32, i32) {
    %c0_i32 = arith.constant 0 : i32
    %c0_i32_0 = arith.constant 0 : i32
    %c0_i32_1 = arith.constant 0 : i32
    return %c0_i32, %c0_i32_0 : i32, i32
  }
  func.func @transform_2(%arg0: i32) -> (i32, i32) {
    %c0_i32 = arith.constant 0 : i32
    %c0_i32_0 = arith.constant 0 : i32
    %c0_i32_1 = arith.constant 0 : i32
    return %c0_i32, %c0_i32_0 : i32, i32
  }
  func.func @transform_3(%arg0: i32) -> (i32, i32) {
    %c0_i32 = arith.constant 0 : i32
    %c0_i32_0 = arith.constant 0 : i32
    return %arg0, %c0_i32 : i32, i32
  }
}

</mosaic_0001>

<bundles_post_ra>
// kernel: squeeze.7
= control target key start
LH: loop header
LB: loop body
LE: loop exit
PB: predicated region body
PF: predicated region fallthrough
CT: control target
= control target key end

     0   :  { %s85_s0 = inlined_call_operand.vmem [shape: f32[2,8], index: 0, kind: input, shape index: {}]   ;;  %s86_s1 = inlined_call_operand.hbm [shape: f32[16], index: 1, kind: output, shape index: {}]  }
   0x1   :  { %v5_v0 = vld [vmem:[%s85_s0] sm:$0x3] }
   0x2   :  { %6 = vst [vmem:[#allocation3] sm:$0x3] %v5_v0 }
   0x3   :  { %2 = vsyncpa [#allocation1], 0  ;;  %vm8_vm0 = vcmask 64512   ;;  %s58_s0 = smov 8   ;;  %vm14_vm1 = vcmask 130112   ;;  %s59_s8 = smov [#allocation0]  }
   0x4   :  { %s26_s9 = sshll.u32 %s59_s8, 4  ;;  %s27_s9 = int_to_ptr.vmem [resolvable:$true] %s26_s9 }
   0x5   :  { %s34_s10 = scalar_lea.vmem %s27_s9, 16  ;;  %s38_s11 = scalar_lea.vmem %s27_s9, 32 }
   0x6   :  { %p35_p0 = scmp.ne.s32.totalorder %s27_s9, %s34_s10  ;;  %p39_p1 = scmp.lt.s32.totalorder %s27_s9, %s27_s9 }
   0x7   :  { %p40_p2 = scmp.lt.s32.totalorder %s38_s11, %s34_s10 }
   0x9   :  { %v11_v1 = vld [vmem:[#allocation3 + $0x1] sm:$0x1]   ;;  %v7_v2 = vld [vmem:[#allocation3] sm:$0x1]   ;;  %p41_p3 = por %p40_p2, %p39_p1 }
   0xa   :  { %12 = vrot.lane.b32.xlu0 %v11_v1, %s58_s0  ;;  %9 = vst.msk [vmem:[#allocation2] sm:$0x1] %vm8_vm0, %v7_v2  }
   0xb   :  { %p42_p4 = pnand %p41_p3, %p35_p0 }
  0x7c   :  { %v13_v3 = vpop.permute.xlu0 %12  }
  0x7d   :  { %15 = vst.msk [vmem:[#allocation2] sm:$0x1] %vm14_vm1, %v13_v3  }
  0x84   :  { %v19_v4 = vld [vmem:[#allocation2] sm:$0x1] }
  0x85   :  { %21 = vst [vmem:[#allocation0] sm:$0x1] %v19_v4 }
  0x86   :  { %45 = shalt.err (!%p42_p4)
}
  0x87   :  { %s46_s14 = scalar_lea.hbm %s86_s1, 16 }
  0x88   :  { %p47_p5 = scmp.ne.s32.totalorder %s86_s1, %s46_s14  ;;  %p50_p6 = scmp.lt.u32.totalorder %s46_s14, %s86_s1 }
  0x8a   :  { %p52_p7 = pnand %p50_p6, %p47_p5 }
  0x8c   :  { %55 = shalt.err (!%p52_p7)
}
  0x8d   :  { %29 = dma.vmem_to_hbm [thread:$0]  %s27_s9, 16, %s86_s1, [#allocation1]  }
  0x8e   :  { %56 = dma.done.wait [#allocation1], 16  }
  0x8f   :  { %57 = vsyncadd [#allocation1], 4294967280 }
  0x90   :  { %31 = vsyncpa [#allocation1], 1 }

// kernel: seq2seq_forward.1
= control target key start
LH: loop header
LB: loop body
LE: loop exit
PB: predicated region body
PF: predicated region fallthrough
CT: control target
= control target key end

     0   :  { %s3126_s12 = smov 0   ;;  %s3756_s0 = inlined_call_operand.vmem [shape: s32[448,1], index: 0, kind: input, shape index: {}]   ;;  %s3757_s1 = inlined_call_operand.vmem [shape: bf16[80,256], index: 1, kind: input, shape index: {}]   ;;  %s3758_s2 = inlined_call_operand.vmem [shape: f32[240,256], index: 2, kind: input, shape index: {}]   ;;  %s3759_s3 = inlined_call_operand.vmem [shape: f32[16,8], index: 3, kind: output, shape index: {}]  }
   0x1 LB: > { %s3132_s13 = sadd.s32 4294967295, %s3098_s12   ;;  %p2443_p0 = scmp.ge.s32.totalorder %s3098_s12, 1  ;;  %s3098_s12 = sphi %s3126_s12, %s13_s12  }
   0x2   : > { %p138_p1 = scmp.lt.s32.totalorder %s3098_s12, 3 }
   0x4   : > { %p139_p2 = pnand %p2443_p0, %p138_p1 }
   0x5   : > { %s161_s14 = smul.u32 (!%p139_p2), 28, %s3132_s13  ;;  %v3100_v0 = vmov (!%p139_p2), 0   ;;  %v2915_v8 = vld [vmem:[%s3757_s1 + $0x4] ss:$8 sps:$4 sm:$0xff] (!%p139_p2)   ;;  %v2917_v9 = vld [vmem:[%s3757_s1] ss:$8 sps:$4 sm:$0xff] (!%p139_p2)   ;;  %v200_v33 = vlaneseq (!%p139_p2) }
   0x6   : > { %142 = sbr.rel (%p139_p2) target bundleno = 9338 (0x247a), region = 32  ;;  %2913 = vset.pattern.permute.xlu0 (!%p139_p2), %v3100_v0  ;;  %2914 = vset.pattern.permute.xlu1 (!%p139_p2), %v3100_v0  ;;  %v2918_v10 = vld [vmem:[%s3757_s1 + $0x14] ss:$8 sps:$4 sm:$0xff] (!%p139_p2)   ;;  %v2920_v12 = vld [vmem:[%s3757_s1 + $0x10] ss:$8 sps:$4 sm:$0xff] (!%p139_p2)   ;;  %v3101_v16 = vmov (!%p139_p2), 0.0  }
   0x7   : > { %p162_p3 = scmp.lt.s32.totalorder (!%p139_p2), %s161_s14, 55  ;;  %401 = vmatprep.mubr.bf16.mxu1 (!%p139_p2), %v3100_v0  ;;  %371 = vmatprep.mubr.bf16.mxu0 (!%p139_p2), %v3100_v0  ;;  %v549_v23 = vld [vmem:[%s3758_s2 + $0x8] sm:$0xff] (!%p139_p2)  ;;  %v551_v24 = vld [vmem:[%s3758_s2 + $0x18] sm:$0xff] (!%p139_p2)  ;;  %v3187_v34 = vand.u32 (!%p139_p2), 127, %v200_v33  ;;  %vm326_vm6 = vcmask (!%p139_p2), 261120   ;;  %vm3102_vm8 = vmmov (!%p139_p2), 0  }
   0x8   : > { %2895 = vmatprep.subr.bf16.mxu1 (!%p139_p2), %v2915_v8  ;;  %339 = vmatprep.subr.bf16.mxu0 (!%p139_p2), %v2915_v8  ;;  %v3179_v25 = vpack.c.bf16 (!%p139_p2), %v551_v24, %v549_v23  ;;  %v2921_v42 = vld [vmem:[%s3757_s1 + $0x20] ss:$8 sps:$4 sm:$0xff] (!%p139_p2)   ;;  %v550_v48 = vld [vmem:[%s3758_s2 + $0x10] sm:$0xff] (!%p139_p2)  ;;  %v555_v51 = vld [vmem:[%s3758_s2 + $0x38] sm:$0xff] (!%p139_p2)  ;;  %vm475_vm10 = vcmask (!%p139_p2), 130048   ;;  %s3103_s10 = smov (!%p139_p2), 64  }
   0x9   : > { %2897 = vmatpush1.bf16.msra.mxu1 (!%p139_p2), %v2917_v9  ;;  %340 = vmatpush1.bf16.msra.mxu0 (!%p139_p2), %v2917_v9  ;;  %v548_v47 = vld [vmem:[%s3758_s2] sm:$0xff] (!%p139_p2)  ;;  %v553_v50 = vld [vmem:[%s3758_s2 + $0x28] sm:$0xff] (!%p139_p2)  ;;  %v554_v59 = vld [vmem:[%s3758_s2 + $0x30] sm:$0xff] (!%p139_p2)  ;;  %s3105_s6 = smov (!%p139_p2), 32   ;;  %p167_p4 = scmp.lt.s32.totalorder (!%p139_p2), %s3132_s13, 1 }
   0xa   : > { %2896 = vmatprep.subr.bf16.mxu1 (!%p139_p2), %v2918_v10  ;;  %341 = vmatprep.subr.bf16.mxu0 (!%p139_p2), %v2918_v10  ;;  %v3218_v54 = vpack.c.bf16 (!%p139_p2), %v550_v48, %v548_v47  ;;  %v3220_v57 = vpack.c.bf16 (!%p139_p2), %v555_v51, %v553_v50  ;;  %v552_v58 = vld [vmem:[%s3758_s2 + $0x20] sm:$0xff] (!%p139_p2)  ;;  %v557_v60 = vld [vmem:[%s3758_s2 + $0x48] sm:$0xff] (!%p139_p2)  ;;  %v559_v61 = vld [vmem:[%s3758_s2 + $0x58] sm:$0xff] (!%p139_p2) }
   0xb   : > { %v3237_v63 = vpack.c.bf16 (!%p139_p2), %v554_v59, %v552_v58 }
   0xd   : > { %s3761_s14 = smov (!%p162_p3, %s161_s14), 55  ;;  %2898 = vmatpush1.bf16.msra.mxu1 %v2920_v12  ;;  %342 = vmatpush1.bf16.msra.mxu0 %v2920_v12  ;;  %s3763_s13 = smov (!%p167_p4, %s3132_s13), 1 }
   0xe   : > { %s2444_s15 = sshll.u32 %s3761_s14, 3  ;;  %2576 = vmatprep.subr.bf16.mxu1 %v3101_v16  ;;  %2724 = vmatprep.subr.bf16.mxu0 %v3179_v25 }
   0xf   : > { %s3144_s18 = scalar_lea.vmem %s3756_s0, %s2444_s15 }
  0x10   : > { %v178_v1 = vld [vmem:[%s3144_s18 + $0x30] sm:$0xff]  ;;  %v187_v4 = vld [vmem:[%s3144_s18 + $0x78] sm:$0xff]  ;;  %v188_v7 = vld [vmem:[%s3144_s18 + $0x80] sm:$0xff] }
  0x11   : > { %v186_v2 = vld [vmem:[%s3144_s18 + $0x70] sm:$0xff]  ;;  %221 = vperm.xlu0 %2913, %v178_v1   ;;  %v179_v5 = vld [vmem:[%s3144_s18 + $0x38] sm:$0xff]  ;;  %v241_v6 = vadd.s32 16, %v187_v4  ;;  %v189_v11 = vld [vmem:[%s3144_s18 + $0x88] sm:$0xff] }
  0x12   : > { %v240_v3 = vadd.s32 16, %v186_v2  ;;  %v190_v13 = vld [vmem:[%s3144_s18 + $0x90] sm:$0xff]  ;;  %v191_v14 = vld [vmem:[%s3144_s18 + $0x98] sm:$0xff]  ;;  %v192_v15 = vld [vmem:[%s3144_s18 + $0xa0] sm:$0xff]  ;;  %v3243_v2 = vpack.c.bf16 %v559_v61, %v557_v60 }
  0x13   : > { %v193_v17 = vld [vmem:[%s3144_s18 + $0xa8] sm:$0xff]  ;;  %v172_v18 = vld [vmem:[%s3144_s18] sm:$0xff]  ;;  %v174_v27 = vld [vmem:[%s3144_s18 + $0x10] sm:$0xff] }
  0x14   : > { %261 = vperm.xlu1 %2914, %v240_v3   ;;  %v180_v19 = vld [vmem:[%s3144_s18 + $0x40] sm:$0xff]  ;;  %v173_v20 = vld [vmem:[%s3144_s18 + $0x8] sm:$0xff]  ;;  %v182_v28 = vld [vmem:[%s3144_s18 + $0x50] sm:$0xff] }
  0x15   : > { %224 = vperm.xlu0 %2913, %v179_v5   ;;  %v181_v21 = vld [vmem:[%s3144_s18 + $0x48] sm:$0xff]  ;;  %v234_v22 = vadd.s32 16, %v180_v19  ;;  %v236_v29 = vadd.s32 16, %v182_v28  ;;  %v176_v30 = vld [vmem:[%s3144_s18 + $0x20] sm:$0xff]  ;;  %v558_v4 = vld [vmem:[%s3758_s2 + $0x50] sm:$0xff] }
  0x16   : > { %v235_v26 = vadd.s32 16, %v181_v21  ;;  %v184_v31 = vld [vmem:[%s3144_s18 + $0x60] sm:$0xff]  ;;  %v175_v59 = vld [vmem:[%s3144_s18 + $0x18] sm:$0xff] }
  0x17   : > { %v238_v32 = vadd.s32 16, %v184_v31  ;;  %v556_v3 = vld [vmem:[%s3758_s2 + $0x40] sm:$0xff]  ;;  %v183_v60 = vld [vmem:[%s3144_s18 + $0x58] sm:$0xff] }
  0x18   : > { %264 = vperm.xlu1 %2914, %v241_v6   ;;  %v561_v6 = vld [vmem:[%s3758_s2 + $0x68] sm:$0xff]  ;;  %v3262_v10 = vpack.c.bf16 %v558_v4, %v556_v3  ;;  %v237_v61 = vadd.s32 16, %v183_v60 }
  0x19   : > { %429 = vperm.xlu0 %2913, %v188_v7   ;;  %v563_v7 = vld [vmem:[%s3758_s2 + $0x78] sm:$0xff] }
  0x1c   : > { %432 = vperm.xlu1 %2914, %v189_v11  }
  0x1d   : > { %435 = vperm.xlu0 %2913, %v190_v13   ;;  %v3265_v13 = vpack.c.bf16 %v563_v7, %v561_v6 }
  0x20   : > { %438 = vperm.xlu1 %2914, %v191_v14   ;;  %v560_v14 = vld [vmem:[%s3758_s2 + $0x60] sm:$0xff] }
  0x21   : > { %441 = vperm.xlu0 %2913, %v192_v15   ;;  %v562_v15 = vld [vmem:[%s3758_s2 + $0x70] sm:$0xff] }
  0x22   : > { %v3282_v19 = vpack.c.bf16 %v562_v15, %v560_v14 }
  0x24   : > { %444 = vperm.xlu1 %2914, %v193_v17  }
  0x25   : > { %203 = vperm.xlu0 %2913, %v172_v18  }
  0x28   : > { %206 = vperm.xlu1 %2914, %v173_v20  }
  0x29   : > { %243 = vperm.xlu0 %2913, %v234_v22  }
  0x2c   : > { %246 = vperm.xlu1 %2914, %v235_v26  }
  0x30   : > { %209 = vperm.xlu1 %2914, %v174_v27  }
  0x34   : > { %249 = vperm.xlu1 %2914, %v236_v29  }
  0x38   : > { %215 = vperm.xlu1 %2914, %v176_v30  }
  0x3c   : > { %255 = vperm.xlu1 %2914, %v238_v32  }
  0x90   : > { %v222_v35 = vpop.permute.xlu0 %221 }
  0x91   : > { %vm232_vm0 = vcmp.eq.s32.totalorder %v3187_v34, %v222_v35 }
  0x93   : > { %v262_v36 = vpop.permute.xlu1 %261 }
  0x94   : > { %vm272_vm1 = vcmp.eq.s32.totalorder %v3187_v34, %v262_v36  ;;  %v225_v37 = vpop.permute.xlu0 %224 }
  0x95   : > { %vm280_vm2 = vmor %vm232_vm0, %vm272_vm1  ;;  %vm233_vm3 = vcmp.eq.s32.totalorder %v3187_v34, %v225_v37 }
  0x96   : > { %v2452_v40 = vsel %vm280_vm2, 1.0, %v3101_v16 }
  0x97   : > { %v265_v38 = vpop.permute.xlu1 %264 }
  0x98   : > { %vm273_vm4 = vcmp.eq.s32.totalorder %v3187_v34, %v265_v38  ;;  %v430_v39 = vpop.permute.xlu0 %429 }
  0x99   : > { %vm281_vm5 = vmor %vm233_vm3, %vm273_vm4  ;;  %vm446_vm9 = vcmp.eq.s32.totalorder %v3187_v34, %v430_v39 }
  0x9a   : > { %v2453_v41 = vsel %vm281_vm5, 1.0, %v3101_v16  ;;  %v2462_v53 = vsel %vm446_vm9, 1.0, %v3101_v16 }
  0x9b   : > { %v301_v43 = vpack.c.bf16 %v2453_v41, %v2452_v40  ;;  %v433_v44 = vpop.permute.xlu1 %432 }
  0x9c   : > { %vm447_vm7 = vcmp.eq.s32.totalorder %v3187_v34, %v433_v44  ;;  %v436_v45 = vpop.permute.xlu0 %435 }
  0x9d   : > { %2461 = vmatmul.mubr.msk.bf16.vlgmr.msra.gmra.mrb[0].mxu1 %vm326_vm6, %v301_v43  ;;  %v2463_v49 = vsel %vm447_vm7, 1.0, %v3101_v16  ;;  %vm448_vm12 = vcmp.eq.s32.totalorder %v3187_v34, %v436_v45 }
  0x9e   : > { %2577 = vmatpush3.bf16.msra.mxu1 %v2921_v42  ;;  %2578 = vmatprep.mubr.msk.bf16.mxu1 %vm3102_vm8, %v3101_v16  ;;  %v464_v55 = vpack.c.bf16 %v2463_v49, %v2462_v53  ;;  %v2464_v9 = vsel %vm448_vm12, 1.0, %v3101_v16 }
  0x9f   : > { %v439_v46 = vpop.permute.xlu1 %438  ;;  %2708 = vmatprep.subr.bf16.mxu1 %v3179_v25 }
  0xa0   : > { %v442_v52 = vpop.permute.xlu0 %441  ;;  %vm449_vm11 = vcmp.eq.s32.totalorder %v3187_v34, %v439_v46 }
  0xa1   : > { %v2465_v5 = vsel %vm449_vm11, 1.0, %v3101_v16  ;;  %vm450_vm4 = vcmp.eq.s32.totalorder %v3187_v34, %v442_v52 }
  0xa2   : > { %v465_v11 = vpack.c.bf16 %v2465_v5, %v2464_v9  ;;  %v2466_v22 = vsel %vm450_vm4, 1.0, %v3101_v16 }
  0xa3   : > { %v445_v56 = vpop.permute.xlu1 %444 }
  0xa4   : > { %v204_v62 = vpop.permute.xlu0 %203  ;;  %vm451_vm2 = vcmp.eq.s32.totalorder %v3187_v34, %v445_v56 }
  0xa5   : > { %2579 = vmatmul.mubr.msk.bf16.vlgmr.msra.gmra.mrb[4].mxu1 %vm475_vm10, %v464_v55  ;;  %vm226_vm13 = vcmp.eq.s32.totalorder %v3187_v34, %v204_v62  ;;  %v2467_v21 = vsel %vm451_vm2, 1.0, %v3101_v16  ;;  %v177_v62 = vld [vmem:[%s3144_s18 + $0x28] sm:$0xff] }
  0xa6   : > { %2710 = vmatpush1.bf16.msra.mxu1 %v3218_v54  ;;  %2582 = vmatprep.mubr.msk.bf16.mxu1 %vm3102_vm8, %v3101_v16  ;;  %v466_v23 = vpack.c.bf16 %v2467_v21, %v2466_v22 }
  0xa7   : > { %v207_v1 = vpop.permute.xlu1 %206  ;;  %2712 = vmatprep.subr.bf16.mxu1 %v3220_v57 }
  0xa8   : > { %v244_v8 = vpop.permute.xlu0 %243  ;;  %vm227_vm0 = vcmp.eq.s32.totalorder %v3187_v34, %v207_v1  ;;  %v185_v1 = vld [vmem:[%s3144_s18 + $0x68] sm:$0xff] }
  0xa9   : > { %vm266_vm14 = vcmp.eq.s32.totalorder %v3187_v34, %v244_v8  ;;  %v239_v3 = vadd.s32 16, %v185_v1 }
  0xaa   : > { %2714 = vmatpush1.bf16.msra.mxu1 %v3237_v63  ;;  %vm274_vm15 = vmor %vm226_vm13, %vm266_vm14 }
  0xab   : > { %v247_v12 = vpop.permute.xlu1 %246  ;;  %2716 = vmatprep.subr.bf16.mxu1 %v3243_v2  ;;  %v2446_v17 = vsel %vm274_vm15, 1.0, %v3101_v16 }
  0xac   : > { %vm267_vm1 = vcmp.eq.s32.totalorder %v3187_v34, %v247_v12 }
  0xad   : > { %vm275_vm3 = vmor %vm227_vm0, %vm267_vm1  ;;  %2583 = vmatmul.mubr.msk.bf16.gmra.mrb[8].mxu1 %vm475_vm10, %v465_v11 }
  0xae   : > { %v2447_v18 = vsel %vm275_vm3, 1.0, %v3101_v16  ;;  %2718 = vmatpush1.bf16.msra.mxu1 %v3262_v10  ;;  %2586 = vmatprep.mubr.msk.bf16.mxu1 %vm3102_vm8, %v3101_v16  ;;  %vm566_vm3 = vcmask 523264  }
  0xaf   : > { %v298_v20 = vpack.c.bf16 %v2447_v18, %v2446_v17  ;;  %2720 = vmatprep.subr.bf16.mxu1 %v3265_v13  ;;  %v210_v11 = vpop.permute.xlu1 %209 }
  0xb0   : > { %vm228_vm7 = vcmp.eq.s32.totalorder %v3187_v34, %v210_v11 }
  0xb1   : > { %2458 = vmatmul.mubr.msk.bf16.vlgmr.msra.gmra.mrb[0].mxu0 %vm326_vm6, %v298_v20 }
  0xb2   : > { %2722 = vmatpush1.bf16.msra.mxu1 %v3282_v19  ;;  %381 = vmatprep.mubr.bf16.mxu0 %v3100_v0 }
  0xb3   : > { %2726 = vmatpush1.bf16.msra.mxu0 %v3218_v54  ;;  %2740 = vmatprep.subr.bf16.mxu1 %v3179_v25  ;;  %v250_v12 = vpop.permute.xlu1 %249 }
  0xb4   : > { %2728 = vmatprep.subr.bf16.mxu0 %v3220_v57  ;;  %vm268_vm5 = vcmp.eq.s32.totalorder %v3187_v34, %v250_v12 }
  0xb5   : > { %2587 = vmatmul.mubr.msk.bf16.gmra.mrb[12].mxu1 %vm475_vm10, %v466_v23  ;;  %vm276_vm9 = vmor %vm228_vm7, %vm268_vm5 }
  0xb6   : > { %634 = vmatprep.mubr.f32.mxu1 %v3101_v16  ;;  %v2448_v23 = vsel %vm276_vm9, 1.0, %v3101_v16 }
  0xb7   : > { %2730 = vmatpush1.bf16.msra.mxu0 %v3237_v63  ;;  %v216_v18 = vpop.permute.xlu1 %215 }
  0xb8   : > { %2732 = vmatprep.subr.bf16.mxu0 %v3243_v2  ;;  %vm230_vm14 = vcmp.eq.s32.totalorder %v3187_v34, %v216_v18 }
  0xbb   : > { %2734 = vmatpush1.bf16.msra.mxu0 %v3262_v10  ;;  %v256_v22 = vpop.permute.xlu1 %255 }
  0xbc   : > { %2736 = vmatprep.subr.bf16.mxu0 %v3265_v13  ;;  %vm270_vm13 = vcmp.eq.s32.totalorder %v3187_v34, %v256_v22 }
  0xbd   : > { %635 = vmatmul.mubr.f32.vlgmr.msra.gmra.mrb[16].mxu1 %v3101_v16  ;;  %vm278_vm15 = vmor %vm230_vm14, %vm270_vm13 }
  0xbe   : > { %2742 = vmatpush1.bf16.msra.mxu1 %v3218_v54  ;;  %838 = vmatprep.mubr.f32.mxu1 %v3101_v16 }
  0xbf   : > { %2738 = vmatpush1.bf16.msra.mxu0 %v3282_v19  ;;  %2744 = vmatprep.subr.bf16.mxu1 %v3220_v57 }
  0xc0   : > { %2756 = vmatprep.subr.bf16.mxu0 %v3179_v25 }
  0xc2   : > { %2746 = vmatpush1.bf16.msra.mxu1 %v3237_v63 }
  0xc3   : > { %2748 = vmatprep.subr.bf16.mxu1 %v3243_v2 }
  0xc6   : > { %2750 = vmatpush1.bf16.msra.mxu1 %v3262_v10 }
  0xc7   : > { %2752 = vmatprep.subr.bf16.mxu1 %v3265_v13 }
  0xca   : > { %2754 = vmatpush1.bf16.msra.mxu1 %v3282_v19 }
  0xcb   : > { %2772 = vmatprep.subr.bf16.mxu1 %v3179_v25 }
 0x170   : > { %v3312_v24 = vpop.f32.mrb[0].mxu1 }
 0x171   : > { %v3314_v26 = vpop.f32.mrb[1].mxu1 }
 0x172   : > { %v3316_v27 = vpop.f32.mrb[2].mxu1 }
 0x173   : > { %v3318_v28 = vpop.f32.mrb[3].mxu1 }
 0x178   : > { %v3320_v29 = vpop.f32.mrb[4].mxu1 }
 0x179   : > { %v2580_v30 = vpop.f32.mrb[5].mxu1 }
 0x17a   : > { %v3322_v31 = vpop.f32.mrb[6].mxu1 }
 0x17b   : > { %v2581_v32 = vpop.f32.mrb[7].mxu1 }
 0x180   : > { %v3324_v35 = vpop.f32.mrb[8].mxu1 }
 0x181   : > { %v2584_v36 = vpop.f32.mrb[9].mxu1 }
 0x182   : > { %v3326_v37 = vpop.f32.mrb[10].mxu1 }
 0x183   : > { %v2585_v38 = vpop.f32.mrb[11].mxu1 }
 0x184   : > { %v373_v39 = vpop.f32.mrb[0].mxu0 }
 0x185   : > { %v375_v40 = vpop.f32.mrb[1].mxu0 }
 0x186   : > { %v3328_v41 = vpop.f32.mrb[2].mxu0 }
 0x187   : > { %v3330_v42 = vpop.f32.mrb[3].mxu0 }
 0x188   : > { %v3332_v43 = vpop.f32.mrb[12].mxu1 }
 0x189   : > { %v2588_v44 = vpop.f32.mrb[13].mxu1 }
 0x18a   : > { %v3334_v45 = vpop.f32.mrb[14].mxu1 }
 0x18b   : > { %v2589_v46 = vpop.f32.mrb[15].mxu1 }
 0x190   : > { %v636_v47 = vpop.f32.mrb[16].mxu1 }
 0x191   : > { %v641_v48 = vadd.f32 %v636_v47, %v373_v39  ;;  %v638_v49 = vpop.f32.mrb[17].mxu1  ;;  %v2450_v39 = vsel %vm278_vm15, 1.0, %v3101_v16 }
 0x192   : > { %v642_v50 = vadd.f32 %v638_v49, %v375_v40 }
 0x193   : > { %v2472_v51 = vmul.f32 -1.442695, %v641_v48 }
 0x194   : > { %v2473_v4 = vmul.f32 -1.442695, %v642_v50 }
 0x195   : > { %2924 = vpow2.f32 %v2472_v51 }
 0x196   : > { %2926 = vtanh.f32 %v642_v50 }
 0x19f   : > { %v2925_v52 = vpop.eup %2924 }
 0x1a0   : > { %v649_v53 = vadd.f32 1.0, %v2925_v52  ;;  %v2927_v55 = vpop.eup %2926 }
 0x1a2   : > { %2928 = vrcp.f32 %v649_v53 }
 0x1a3   : > { %2930 = vpow2.f32 %v2473_v4 }
 0x1ac   : > { %v2929_v56 = vpop.eup %2928 }
 0x1ad   : > { %v657_v58 = vmul.f32 %v2929_v56, %v2927_v55  ;;  %v2931_v5 = vpop.eup %2930  ;;  %v656_v7 = vmul.f32 0.0, %v2929_v56 }
 0x1ae   : > { %v650_v6 = vadd.f32 1.0, %v2931_v5 }
 0x1af   : > { %659 = vrot.lane.b32.xlu0 %v657_v58, %s3103_s10 }
 0x1b0   : > { %2932 = vrcp.f32 %v650_v6 }
 0x1b3   : > { %212 = vperm.xlu0 %2913, %v175_v59  }
 0x1b7   : > { %252 = vperm.xlu0 %2913, %v237_v61  }
 0x1ba   : > { %v2933_v14 = vpop.eup %2932 }
 0x1bb   : > { %218 = vperm.xlu0 %2913, %v177_v62  }
 0x1bf   : > { %258 = vperm.xlu0 %2913, %v239_v3  }
 0x221   : > { %v660_v8 = vpop.permute.xlu0 %659 }
 0x222   : > { %v3341_v9 = vadd.f32 %v660_v8, %v656_v7 }
 0x224   : > { %2934 = vtanh.f32 %v3341_v9 }
 0x22e   : > { %v2935_v15 = vpop.eup %2934 }
 0x22f   : > { %v664_v17 = vmul.f32 %v2935_v15, %v2933_v14 }
 0x231   : > { %668 = vrot.lane.b32.xlu1 %v664_v17, %s3103_s10 }
 0x232   : > { %v213_v20 = vpop.permute.xlu0 %212 }
 0x233   : > { %vm229_vm10 = vcmp.eq.s32.totalorder %v3187_v34, %v213_v20 }
 0x236   : > { %v253_v21 = vpop.permute.xlu0 %252 }
 0x237   : > { %vm269_vm11 = vcmp.eq.s32.totalorder %v3187_v34, %v253_v21 }
 0x238   : > { %vm277_vm12 = vmor %vm229_vm10, %vm269_vm11 }
 0x239   : > { %v2449_v30 = vsel %vm277_vm12, 1.0, %v3101_v16 }
 0x23a   : > { %v299_v32 = vpack.c.bf16 %v2449_v30, %v2448_v23  ;;  %v219_v36 = vpop.permute.xlu0 %218 }
 0x23b   : > { %vm231_vm0 = vcmp.eq.s32.totalorder %v3187_v34, %v219_v36 }
 0x23c   : > { %2459 = vmatmul.mubr.msk.bf16.gmra.mrb[4].mxu0 %vm326_vm6, %v299_v32 }
 0x23d   : > { %391 = vmatprep.mubr.bf16.mxu0 %v3100_v0 }
 0x23e   : > { %v259_v38 = vpop.permute.xlu0 %258 }
 0x23f   : > { %vm271_vm1 = vcmp.eq.s32.totalorder %v3187_v34, %v259_v38 }
 0x240   : > { %vm279_vm2 = vmor %vm231_vm0, %vm271_vm1 }
 0x241   : > { %v2451_v40 = vsel %vm279_vm2, 1.0, %v3101_v16 }
 0x242   : > { %v300_v44 = vpack.c.bf16 %v2451_v40, %v2450_v39 }
 0x244   : > { %2460 = vmatmul.mubr.msk.bf16.gmra.mrb[8].mxu0 %vm326_vm6, %v300_v44 }
 0x245   : > { %736 = vmatprep.mubr.f32.mxu0 %v3101_v16 }
 0x2a3   : > { %v669_v46 = vpop.permute.xlu1 %668 }
 0x2a4   : > { %2474 = vmatmul.mubr.msk.f32.vlgmr.msra.gmra.mrb[12].mxu0 %vm566_vm3, %v669_v46 }
 0x2a5   : > { %2758 = vmatpush1.bf16.msra.mxu0 %v3218_v54  ;;  %940 = vmatprep.mubr.f32.mxu0 %v3101_v16 }
 0x2a6   : > { %2760 = vmatprep.subr.bf16.mxu0 %v3220_v57 }
 0x2a9   : > { %2762 = vmatpush1.bf16.msra.mxu0 %v3237_v63 }
 0x2aa   : > { %2764 = vmatprep.subr.bf16.mxu0 %v3243_v2 }
 0x2ad   : > { %2766 = vmatpush1.bf16.msra.mxu0 %v3262_v10 }
 0x2ae   : > { %2768 = vmatprep.subr.bf16.mxu0 %v3265_v13 }
 0x2b1   : > { %2770 = vmatpush1.bf16.msra.mxu0 %v3282_v19 }
 0x2b2   : > { %2788 = vmatprep.subr.bf16.mxu0 %v3179_v25 }
 0x30f   : > { %v383_v0 = vpop.f32.mrb[4].mxu0 }
 0x310   : > { %v385_v47 = vpop.f32.mrb[5].mxu0 }
 0x311   : > { %v3371_v48 = vpop.f32.mrb[6].mxu0 }
 0x312   : > { %v3373_v49 = vpop.f32.mrb[7].mxu0 }
 0x317   : > { %v3375_v50 = vpop.f32.mrb[8].mxu0 }
 0x318   : > { %v3377_v51 = vpop.f32.mrb[9].mxu0 }
 0x319   : > { %v3379_v52 = vpop.f32.mrb[10].mxu0 }
 0x31a   : > { %v3381_v53 = vpop.f32.mrb[11].mxu0 }
 0x377   : > { %v738_v55 = vpop.f32.mrb[12].mxu0 }
 0x378   : > { %v743_v56 = vadd.f32 %v738_v55, %v3328_v41  ;;  %v740_v58 = vpop.f32.mrb[13].mxu0 }
 0x379   : > { %v744_v59 = vadd.f32 %v740_v58, %v3330_v42 }
 0x37a   : > { %v2475_v60 = vmul.f32 -1.442695, %v743_v56 }
 0x37b   : > { %v2476_v5 = vmul.f32 -1.442695, %v744_v59 }
 0x37c   : > { %2936 = vpow2.f32 %v2475_v60 }
 0x37d   : > { %2938 = vtanh.f32 %v744_v59 }
 0x386   : > { %v2937_v61 = vpop.eup %2936 }
 0x387   : > { %v751_v62 = vadd.f32 1.0, %v2937_v61  ;;  %v2939_v1 = vpop.eup %2938 }
 0x389   : > { %2940 = vrcp.f32 %v751_v62 }
 0x38a   : > { %2942 = vpow2.f32 %v2476_v5 }
 0x393   : > { %v2941_v3 = vpop.eup %2940 }
 0x394   : > { %v759_v4 = vmul.f32 %v2941_v3, %v2939_v1  ;;  %v2943_v6 = vpop.eup %2942  ;;  %v758_v41 = vmul.f32 %v2941_v3, %v3341_v9 }
 0x395   : > { %v752_v7 = vadd.f32 1.0, %v2943_v6 }
 0x396   : > { %761 = vrot.lane.b32.xlu0 %v759_v4, %s3103_s10 }
 0x397   : > { %2944 = vrcp.f32 %v752_v7 }
 0x3a1   : > { %v2945_v42 = vpop.eup %2944 }
 0x408   : > { %v762_v8 = vpop.permute.xlu0 %761 }
 0x409   : > { %v764_v11 = vadd.f32 %v762_v8, %v758_v41 }
 0x40b   : > { %2946 = vtanh.f32 %v764_v11 }
 0x415   : > { %v2947_v12 = vpop.eup %2946 }
 0x416   : > { %v766_v14 = vmul.f32 %v2947_v12, %v2945_v42 }
 0x418   : > { %770 = vrot.lane.b32.xlu1 %v766_v14, %s3103_s10 }
 0x48a   : > { %v771_v15 = vpop.permute.xlu1 %770 }
 0x48b   : > { %2477 = vmatmul.mubr.msk.f32.vlgmr.msra.gmra.mrb[18].mxu1 %vm566_vm3, %v771_v15 }
 0x48c   : > { %2774 = vmatpush1.bf16.msra.mxu1 %v3218_v54  ;;  %1042 = vmatprep.mubr.f32.mxu1 %v3101_v16 }
 0x48d   : > { %2776 = vmatprep.subr.bf16.mxu1 %v3220_v57 }
 0x490   : > { %2778 = vmatpush1.bf16.msra.mxu1 %v3237_v63 }
 0x491   : > { %2780 = vmatprep.subr.bf16.mxu1 %v3243_v2 }
 0x494   : > { %2782 = vmatpush1.bf16.msra.mxu1 %v3262_v10 }
 0x495   : > { %2784 = vmatprep.subr.bf16.mxu1 %v3265_v13 }
 0x498   : > { %2786 = vmatpush1.bf16.msra.mxu1 %v3282_v19 }
 0x499   : > { %2804 = vmatprep.subr.bf16.mxu1 %v3179_v25 }
 0x55e   : > { %v840_v9 = vpop.f32.mrb[18].mxu1 }
 0x55f   : > { %v845_v17 = vadd.f32 %v840_v9, %v383_v0  ;;  %v842_v18 = vpop.f32.mrb[19].mxu1 }
 0x560   : > { %v846_v20 = vadd.f32 %v842_v18, %v385_v47 }
 0x561   : > { %v2478_v21 = vmul.f32 -1.442695, %v845_v17 }
 0x562   : > { %v2479_v38 = vmul.f32 -1.442695, %v846_v20 }
 0x563   : > { %2948 = vpow2.f32 %v2478_v21 }
 0x564   : > { %2950 = vtanh.f32 %v846_v20 }
 0x56d   : > { %v2949_v22 = vpop.eup %2948 }
 0x56e   : > { %v853_v23 = vadd.f32 1.0, %v2949_v22  ;;  %v2951_v30 = vpop.eup %2950 }
 0x570   : > { %2952 = vrcp.f32 %v853_v23 }
 0x571   : > { %2954 = vpow2.f32 %v2479_v38 }
 0x57a   : > { %v2953_v32 = vpop.eup %2952 }
 0x57b   : > { %v861_v36 = vmul.f32 %v2953_v32, %v2951_v30  ;;  %v2955_v39 = vpop.eup %2954  ;;  %v860_v44 = vmul.f32 %v2953_v32, %v764_v11 }
 0x57c   : > { %v854_v40 = vadd.f32 1.0, %v2955_v39 }
 0x57d   : > { %863 = vrot.lane.b32.xlu0 %v861_v36, %s3103_s10 }
 0x57e   : > { %2956 = vrcp.f32 %v854_v40 }
 0x588   : > { %v2957_v47 = vpop.eup %2956 }
 0x5ef   : > { %v864_v46 = vpop.permute.xlu0 %863 }
 0x5f0   : > { %v866_v0 = vadd.f32 %v864_v46, %v860_v44 }
 0x5f2   : > { %2958 = vtanh.f32 %v866_v0 }
 0x5fc   : > { %v2959_v55 = vpop.eup %2958 }
 0x5fd   : > { %v868_v56 = vmul.f32 %v2959_v55, %v2957_v47 }
 0x5ff   : > { %872 = vrot.lane.b32.xlu1 %v868_v56, %s3103_s10 }
 0x671   : > { %v873_v58 = vpop.permute.xlu1 %872 }
 0x672   : > { %2480 = vmatmul.mubr.msk.f32.vlgmr.msra.gmra.mrb[14].mxu0 %vm566_vm3, %v873_v58 }
 0x673   : > { %2790 = vmatpush1.bf16.msra.mxu0 %v3218_v54  ;;  %1144 = vmatprep.mubr.f32.mxu0 %v3101_v16 }
 0x674   : > { %2792 = vmatprep.subr.bf16.mxu0 %v3220_v57 }
 0x677   : > { %2794 = vmatpush1.bf16.msra.mxu0 %v3237_v63 }
 0x678   : > { %2796 = vmatprep.subr.bf16.mxu0 %v3243_v2 }
 0x67b   : > { %2798 = vmatpush1.bf16.msra.mxu0 %v3262_v10 }
 0x67c   : > { %2800 = vmatprep.subr.bf16.mxu0 %v3265_v13 }
 0x67f   : > { %2802 = vmatpush1.bf16.msra.mxu0 %v3282_v19 }
 0x680   : > { %2820 = vmatprep.subr.bf16.mxu0 %v3179_v25 }
 0x745   : > { %v942_v59 = vpop.f32.mrb[14].mxu0 }
 0x746   : > { %v947_v60 = vadd.f32 %v942_v59, %v3371_v48  ;;  %v944_v61 = vpop.f32.mrb[15].mxu0 }
 0x747   : > { %v948_v62 = vadd.f32 %v944_v61, %v3373_v49 }
 0x748   : > { %v2481_v1 = vmul.f32 -1.442695, %v947_v60 }
 0x749   : > { %v2482_v41 = vmul.f32 -1.442695, %v948_v62 }
 0x74a   : > { %2960 = vpow2.f32 %v2481_v1 }
 0x74b   : > { %2962 = vtanh.f32 %v948_v62 }
 0x754   : > { %v2961_v3 = vpop.eup %2960 }
 0x755   : > { %v955_v4 = vadd.f32 1.0, %v2961_v3  ;;  %v2963_v5 = vpop.eup %2962 }
 0x757   : > { %2964 = vrcp.f32 %v955_v4 }
 0x758   : > { %2966 = vpow2.f32 %v2482_v41 }
 0x761   : > { %v2965_v6 = vpop.eup %2964 }
 0x762   : > { %v963_v7 = vmul.f32 %v2965_v6, %v2963_v5  ;;  %v2967_v25 = vpop.eup %2966  ;;  %v962_v11 = vmul.f32 %v2965_v6, %v866_v0 }
 0x763   : > { %v956_v8 = vadd.f32 1.0, %v2967_v25 }
 0x764   : > { %965 = vrot.lane.b32.xlu0 %v963_v7, %s3103_s10 }
 0x765   : > { %2968 = vrcp.f32 %v956_v8 }
 0x76f   : > { %v2969_v49 = vpop.eup %2968 }
 0x7d6   : > { %v966_v48 = vpop.permute.xlu0 %965 }
 0x7d7   : > { %v968_v42 = vadd.f32 %v966_v48, %v962_v11 }
 0x7d9   : > { %2970 = vtanh.f32 %v968_v42 }
 0x7e3   : > { %v2971_v12 = vpop.eup %2970 }
 0x7e4   : > { %v970_v14 = vmul.f32 %v2971_v12, %v2969_v49 }
 0x7e6   : > { %974 = vrot.lane.b32.xlu1 %v970_v14, %s3103_s10 }
 0x858   : > { %v975_v15 = vpop.permute.xlu1 %974 }
 0x859   : > { %2483 = vmatmul.mubr.msk.f32.vlgmr.msra.gmra.mrb[20].mxu1 %vm566_vm3, %v975_v15 }
 0x85a   : > { %2806 = vmatpush1.bf16.msra.mxu1 %v3218_v54  ;;  %1246 = vmatprep.mubr.f32.mxu1 %v3101_v16 }
 0x85b   : > { %2808 = vmatprep.subr.bf16.mxu1 %v3220_v57 }
 0x85e   : > { %2810 = vmatpush1.bf16.msra.mxu1 %v3237_v63 }
 0x85f   : > { %2812 = vmatprep.subr.bf16.mxu1 %v3243_v2 }
 0x862   : > { %2814 = vmatpush1.bf16.msra.mxu1 %v3262_v10 }
 0x863   : > { %2816 = vmatprep.subr.bf16.mxu1 %v3265_v13 }
 0x866   : > { %2818 = vmatpush1.bf16.msra.mxu1 %v3282_v19 }
 0x92c   : > { %v1044_v9 = vpop.f32.mrb[20].mxu1 }
 0x92d   : > { %v1049_v17 = vadd.f32 %v1044_v9, %v3375_v50  ;;  %v1046_v18 = vpop.f32.mrb[21].mxu1 }
 0x92e   : > { %v1050_v20 = vadd.f32 %v1046_v18, %v3377_v51 }
 0x92f   : > { %v2484_v21 = vmul.f32 -1.442695, %v1049_v17 }
 0x930   : > { %v2485_v38 = vmul.f32 -1.442695, %v1050_v20 }
 0x931   : > { %2972 = vpow2.f32 %v2484_v21 }
 0x932   : > { %2974 = vtanh.f32 %v1050_v20 }
 0x93b   : > { %v2973_v22 = vpop.eup %2972 }
 0x93c   : > { %v1057_v23 = vadd.f32 1.0, %v2973_v22  ;;  %v2975_v30 = vpop.eup %2974 }
 0x93e   : > { %2976 = vrcp.f32 %v1057_v23 }
 0x93f   : > { %2978 = vpow2.f32 %v2485_v38 }
 0x948   : > { %v2977_v32 = vpop.eup %2976 }
 0x949   : > { %v1065_v36 = vmul.f32 %v2977_v32, %v2975_v30  ;;  %v2979_v39 = vpop.eup %2978  ;;  %v1064_v44 = vmul.f32 %v2977_v32, %v968_v42 }
 0x94a   : > { %v1058_v40 = vadd.f32 1.0, %v2979_v39 }
 0x94b   : > { %1067 = vrot.lane.b32.xlu0 %v1065_v36, %s3103_s10 }
 0x94c   : > { %2980 = vrcp.f32 %v1058_v40 }
 0x956   : > { %v2981_v51 = vpop.eup %2980 }
 0x9bd   : > { %v1068_v50 = vpop.permute.xlu0 %1067 }
 0x9be   : > { %v1070_v46 = vadd.f32 %v1068_v50, %v1064_v44 }
 0x9c0   : > { %2982 = vtanh.f32 %v1070_v46 }
 0x9ca   : > { %v2983_v0 = vpop.eup %2982 }
 0x9cb   : > { %v1072_v47 = vmul.f32 %v2983_v0, %v2981_v51  ;;  %v1379_v0 = vld [vmem:[%s3758_s2 + $0xc0] sm:$0xff] }
 0x9cd   : > { %1076 = vrot.lane.b32.xlu1 %v1072_v47, %s3103_s10  ;;  %v3104_v47 = vmov 0.0|0.0  }
 0x9ce   : > { %2835 = vmatprep.subr.bf16.mxu1 %v3104_v47 }
 0xa3f   : > { %v1077_v55 = vpop.permute.xlu1 %1076 }
 0xa40   : > { %2486 = vmatmul.mubr.msk.f32.vlgmr.msra.gmra.mrb[16].mxu0 %vm566_vm3, %v1077_v55 }
 0xa41   : > { %2822 = vmatpush1.bf16.msra.mxu0 %v3218_v54  ;;  %1348 = vmatprep.mubr.f32.mxu0 %v3101_v16 }
 0xa42   : > { %2824 = vmatprep.subr.bf16.mxu0 %v3220_v57 }
 0xa45   : > { %2826 = vmatpush1.bf16.msra.mxu0 %v3237_v63 }
 0xa46   : > { %2828 = vmatprep.subr.bf16.mxu0 %v3243_v2 }
 0xa49   : > { %2830 = vmatpush1.bf16.msra.mxu0 %v3262_v10 }
 0xa4a   : > { %2832 = vmatprep.subr.bf16.mxu0 %v3265_v13 }
 0xa4d   : > { %2834 = vmatpush1.bf16.msra.mxu0 %v3282_v19 }
 0xa4e   : > { %2859 = vmatprep.subr.bf16.mxu0 %v3104_v47 }
 0xb13   : > { %v1146_v56 = vpop.f32.mrb[16].mxu0 }
 0xb14   : > { %v1151_v58 = vadd.f32 %v1146_v56, %v3379_v52  ;;  %v1148_v59 = vpop.f32.mrb[17].mxu0  ;;  %v1382_v56 = vld [vmem:[%s3758_s2 + $0xf0] sm:$0xff] }
 0xb15   : > { %v1152_v54 = vadd.f32 %v1148_v59, %v3381_v53  ;;  %v1383_v59 = vld [vmem:[%s3758_s2 + $0x100] sm:$0xff] }
 0xb16   : > { %v2487_v60 = vmul.f32 -1.442695, %v1151_v58 }
 0xb17   : > { %v2488_v10 = vmul.f32 -1.442695, %v1152_v54 }
 0xb18   : > { %2984 = vpow2.f32 %v2487_v60 }
 0xb19   : > { %2986 = vtanh.f32 %v1152_v54  ;;  %v1384_v54 = vld [vmem:[%s3758_s2 + $0x110] sm:$0xff] }
 0xb1a   : > { %v2842_v60 = vpack.c.bf16 %v1384_v54, %v1383_v59 }
 0xb22   : > { %v2985_v61 = vpop.eup %2984 }
 0xb23   : > { %v1159_v57 = vadd.f32 1.0, %v2985_v61  ;;  %v2987_v63 = vpop.eup %2986  ;;  %v1385_v61 = vld [vmem:[%s3758_s2 + $0x120] sm:$0xff] }
 0xb25   : > { %2988 = vrcp.f32 %v1159_v57  ;;  %v1386_v57 = vld [vmem:[%s3758_s2 + $0x130] sm:$0xff] }
 0xb26   : > { %2990 = vpow2.f32 %v2488_v10 }
 0xb2f   : > { %v2989_v2 = vpop.eup %2988 }
 0xb30   : > { %v1167_v62 = vmul.f32 %v2989_v2, %v2987_v63  ;;  %v2991_v13 = vpop.eup %2990  ;;  %v1166_v1 = vmul.f32 %v2989_v2, %v1070_v46  ;;  %v2845_v63 = vpack.c.bf16 %v1386_v57, %v1385_v61  ;;  %v1387_v2 = vld [vmem:[%s3758_s2 + $0x140] sm:$0xff] }
 0xb31   : > { %v1160_v19 = vadd.f32 1.0, %v2991_v13  ;;  %v1389_v13 = vld [vmem:[%s3758_s2 + $0x160] sm:$0xff] }
 0xb32   : > { %1169 = vrot.lane.b32.xlu0 %v1167_v62, %s3103_s10  ;;  %v1388_v62 = vld [vmem:[%s3758_s2 + $0x150] sm:$0xff] }
 0xb33   : > { %2992 = vrcp.f32 %v1160_v19  ;;  %v2848_v10 = vpack.c.bf16 %v1388_v62, %v1387_v2  ;;  %v1390_v19 = vld [vmem:[%s3758_s2 + $0x170] sm:$0xff] }
 0xb3d   : > { %v2993_v53 = vpop.eup %2992 }
 0xba4   : > { %v1170_v52 = vpop.permute.xlu0 %1169 }
 0xba5   : > { %v1172_v3 = vadd.f32 %v1170_v52, %v1166_v1  ;;  %v2851_v1 = vpack.c.bf16 %v1390_v19, %v1389_v13  ;;  %v1391_v52 = vld [vmem:[%s3758_s2 + $0x180] sm:$0xff] }
 0xba7   : > { %2994 = vtanh.f32 %v1172_v3 }
 0xbb1   : > { %v2995_v4 = vpop.eup %2994 }
 0xbb2   : > { %v1174_v5 = vmul.f32 %v2995_v4, %v2993_v53  ;;  %v1393_v4 = vld [vmem:[%s3758_s2 + $0x1a0] sm:$0xff] }
 0xbb4   : > { %1178 = vrot.lane.b32.xlu1 %v1174_v5, %s3103_s10  ;;  %v1394_v5 = vld [vmem:[%s3758_s2 + $0x1b0] sm:$0xff] }
 0xc26   : > { %v1179_v6 = vpop.permute.xlu1 %1178 }
 0xc27   : > { %2489 = vmatmul.mubr.msk.f32.vlgmr.msra.gmra.mrb[22].mxu1 %vm566_vm3, %v1179_v6  ;;  %v2857_v6 = vpack.c.bf16 %v1394_v5, %v1393_v4 }
 0xc28   : > { %2622 = vmatprep.mubr.msk.f32.mxu1 %vm3102_vm8, %v3101_v16 }
 0xcfa   : > { %v1248_v7 = vpop.f32.mrb[22].mxu1 }
 0xcfb   : > { %v1253_v41 = vadd.f32 %v1248_v7, %v3312_v24  ;;  %v1250_v25 = vpop.f32.mrb[23].mxu1 }
 0xcfc   : > { %v1254_v8 = vadd.f32 %v1250_v25, %v3314_v26 }
 0xcfd   : > { %v2490_v11 = vmul.f32 -1.442695, %v1253_v41 }
 0xcfe   : > { %v2491_v15 = vmul.f32 -1.442695, %v1254_v8 }
 0xcff   : > { %2996 = vpow2.f32 %v2490_v11 }
 0xd00   : > { %2998 = vtanh.f32 %v1254_v8 }
 0xd09   : > { %v2997_v48 = vpop.eup %2996 }
 0xd0a   : > { %v1261_v42 = vadd.f32 1.0, %v2997_v48  ;;  %v2999_v49 = vpop.eup %2998 }
 0xd0c   : > { %3000 = vrcp.f32 %v1261_v42  ;;  %v1471_v42 = vld [vmem:[%s3758_s2 + $0x80] sm:$0xff] }
 0xd0d   : > { %3002 = vpow2.f32 %v2491_v15 }
 0xd16   : > { %v3001_v12 = vpop.eup %3000 }
 0xd17   : > { %v1269_v14 = vmul.f32 %v3001_v12, %v2999_v49  ;;  %v3003_v9 = vpop.eup %3002  ;;  %v1268_v18 = vmul.f32 %v3001_v12, %v1172_v3  ;;  %v1392_v3 = vld [vmem:[%s3758_s2 + $0x190] sm:$0xff] }
 0xd18   : > { %v1262_v17 = vadd.f32 1.0, %v3003_v9  ;;  %v2854_v53 = vpack.c.bf16 %v1392_v3, %v1391_v52  ;;  %v1472_v49 = vld [vmem:[%s3758_s2 + $0x90] sm:$0xff] }
 0xd19   : > { %1271 = vrot.lane.b32.xlu0 %v1269_v14, %s3103_s10  ;;  %v3521_v12 = vpack.c.bf16 %v1472_v49, %v1471_v42 }
 0xd1a   : > { %3004 = vrcp.f32 %v1262_v17 }
 0xd24   : > { %v3005_v26 = vpop.eup %3004 }
 0xd8b   : > { %v1272_v24 = vpop.permute.xlu0 %1271 }
 0xd8c   : > { %v3446_v20 = vadd.f32 %v1272_v24, %v1268_v18  ;;  %v1473_v24 = vld [vmem:[%s3758_s2 + $0xa0] sm:$0xff] }
 0xd8e   : > { %3006 = vtanh.f32 %v3446_v20 }
 0xd98   : > { %v3007_v21 = vpop.eup %3006 }
 0xd99   : > { %v1276_v22 = vmul.f32 %v3007_v21, %v3005_v26  ;;  %v1395_v21 = vld [vmem:[%s3758_s2 + $0x1c0] ss:$0 sm:$0xff] }
 0xd9b   : > { %1280 = vrot.lane.b32.xlu1 %v1276_v22, %s3103_s10 }
 0xe0d   : > { %v1281_v23 = vpop.permute.xlu1 %1280 }
 0xe0e   : > { %2492 = vmatmul.mubr.msk.f32.vlgmr.msra.gmra.mrb[18].mxu0 %vm566_vm3, %v1281_v23 }
 0xe0f   : > { %2633 = vmatprep.mubr.msk.f32.mxu0 %vm3102_vm8, %v3101_v16  ;;  %2861 = vmatpush3.bf16.msra.mxu0 %v3521_v12 }
 0xe10   : > { %2862 = vmatprep.subr.bf16.mxu0 %v3104_v47 }
 0xee1   : > { %v1350_v30 = vpop.f32.mrb[18].mxu0 }
 0xee2   : > { %v1355_v32 = vadd.f32 %v1350_v30, %v3316_v27  ;;  %v1352_v36 = vpop.f32.mrb[19].mxu0  ;;  %v1380_v27 = vld [vmem:[%s3758_s2 + $0xd0] sm:$0xff] }
 0xee3   : > { %v1356_v38 = vadd.f32 %v1352_v36, %v3318_v28  ;;  %v1381_v28 = vld [vmem:[%s3758_s2 + $0xe0] sm:$0xff]  ;;  %v2836_v55 = vpack.c.bf16 %v1380_v27, %v1379_v0 }
 0xee4   : > { %v2493_v39 = vmul.f32 -1.442695, %v1355_v32  ;;  %v2839_v58 = vpack.c.bf16 %v1382_v56, %v1381_v28 }
 0xee5   : > { %2837 = vmatpush3.bf16.msra.mxu1 %v2836_v55  ;;  %v2494_v7 = vmul.f32 -1.442695, %v1356_v38 }
 0xee6   : > { %3008 = vpow2.f32 %v2493_v39  ;;  %2838 = vmatprep.subr.bf16.mxu1 %v3104_v47 }
 0xee7   : > { %3010 = vtanh.f32 %v1356_v38 }
 0xee9   : > { %2840 = vmatpush3.bf16.msra.mxu1 %v2839_v58 }
 0xeea   : > { %2841 = vmatprep.subr.bf16.mxu1 %v3104_v47 }
 0xeed   : > { %2843 = vmatpush3.bf16.msra.mxu1 %v2842_v60 }
 0xeee   : > { %2844 = vmatprep.subr.bf16.mxu1 %v3104_v47 }
 0xef0   : > { %v3009_v40 = vpop.eup %3008 }
 0xef1   : > { %v1363_v44 = vadd.f32 1.0, %v3009_v40  ;;  %v3011_v50 = vpop.eup %3010  ;;  %2846 = vmatpush3.bf16.msra.mxu1 %v2845_v63 }
 0xef2   : > { %2847 = vmatprep.subr.bf16.mxu1 %v3104_v47 }
 0xef3   : > { %3012 = vrcp.f32 %v1363_v44 }
 0xef4   : > { %3014 = vpow2.f32 %v2494_v7 }
 0xef5   : > { %2849 = vmatpush3.bf16.msra.mxu1 %v2848_v10 }
 0xef6   : > { %2850 = vmatprep.subr.bf16.mxu1 %v3104_v47 }
 0xef9   : > { %2852 = vmatpush3.bf16.msra.mxu1 %v2851_v1 }
 0xefa   : > { %2853 = vmatprep.subr.bf16.mxu1 %v3104_v47 }
 0xefd   : > { %v3013_v46 = vpop.eup %3012  ;;  %2855 = vmatpush3.bf16.msra.mxu1 %v2854_v53 }
 0xefe   : > { %v1371_v51 = vmul.f32 %v3013_v46, %v3011_v50  ;;  %2856 = vmatprep.subr.bf16.mxu1 %v3104_v47  ;;  %v3015_v41 = vpop.eup %3014  ;;  %v1370_v8 = vmul.f32 %v3013_v46, %v3446_v20  ;;  %v1474_v20 = vld [vmem:[%s3758_s2 + $0xb0] sm:$0xff] }
 0xeff   : > { %v1364_v25 = vadd.f32 1.0, %v3015_v41  ;;  %v3537_v26 = vpack.c.bf16 %v1474_v20, %v1473_v24 }
 0xf00   : > { %1373 = vrot.lane.b32.xlu0 %v1371_v51, %s3103_s10 }
 0xf01   : > { %2858 = vmatpush3.bf16.msra.mxu1 %v2857_v6  ;;  %3016 = vrcp.f32 %v1364_v25  ;;  %2864 = vmatpush3.bf16.msra.mxu0 %v3537_v26 }
 0xf02   : > { %2877 = vmatprep.subr.bf16.mxu1 %v3104_v47  ;;  %2865 = vmatprep.subr.bf16.mxu0 %v3104_v47 }
 0xf0b   : > { %v3017_v14 = vpop.eup %3016 }
 0xf72   : > { %v1374_v11 = vpop.permute.xlu0 %1373 }
 0xf73   : > { %v1376_v48 = vadd.f32 %v1374_v11, %v1370_v8 }
 0xf75   : > { %3018 = vtanh.f32 %v1376_v48 }
 0xf7f   : > { %v3019_v15 = vpop.eup %3018 }
 0xf80   : > { %v1378_v9 = vmul.f32 %v3019_v15, %v3017_v14 }
 0xf82   : > { %1397 = vrot.lane.b32.xlu1 %v1378_v9, %s3103_s10 }
 0xff4   : > { %v1398_v17 = vpop.permute.xlu1 %1397 }
 0xff5   : > { %v1400_v18 = vsel %vm566_vm3, %v1398_v17, %v1376_v48 }
 0xff6   : > { %2623 = vmatmul.mubr.f32.vlgmr.msra.gmra.mrb[24].mxu1 %v1400_v18 }
 0xff7   : > { %2879 = vmatpush3.bf16.msra.mxu1 %v3521_v12  ;;  %2666 = vmatprep.mubr.msk.f32.mxu1 %vm3102_vm8, %v3101_v16 }
 0xff8   : > { %2880 = vmatprep.subr.bf16.mxu1 %v3104_v47 }
 0xffb   : > { %2882 = vmatpush3.bf16.msra.mxu1 %v3537_v26 }
 0xffc   : > { %2889 = vmatprep.subr.bf16.mxu1 %v3104_v47 }
0x10c9   : > { %v1467_v22 = vpop.f32.mrb[24].mxu1 }
0x10ca   : > { %v1468_v23 = vadd.f32 %v1467_v22, %v1395_v21  ;;  %v2624_v30 = vpop.f32.mrb[25].mxu1 }
0x10cc   : > { %2634 = vmatmul.mubr.msk.f32.vlgmr.msra.gmra.mrb[20].mxu0 %vm326_vm6, %v1468_v23 }
0x10cd   : > { %2867 = vmatpush3.bf16.msra.mxu0 %v3521_v12  ;;  %2644 = vmatprep.mubr.msk.f32.mxu0 %vm3102_vm8, %v3101_v16 }
0x10ce   : > { %2868 = vmatprep.subr.bf16.mxu0 %v3104_v47 }
0x10d1   : > { %2870 = vmatpush3.bf16.msra.mxu0 %v3537_v26 }
0x10d2   : > { %2871 = vmatprep.subr.bf16.mxu0 %v3104_v47 }
0x119f   : > { %v1545_v32 = vpop.f32.mrb[20].mxu0 }
0x11a0   : > { %v1549_v36 = vadd.f32 %v1545_v32, %v3320_v29  ;;  %v2635_v38 = vpop.f32.mrb[21].mxu0 }
0x11a2   : > { %3020 = vtanh.f32 %v1549_v36  ;;  %v2496_v40 = vmul.f32 -1.442695, %v1549_v36 }
0x11a4   : > { %3022 = vpow2.f32 %v2496_v40 }
0x11ac   : > { %v3021_v39 = vpop.eup %3020 }
0x11ad   : > { %1559 = vrot.lane.b32.xlu0 %v3021_v39, %s3103_s10 }
0x11ae   : > { %v3023_v44 = vpop.eup %3022 }
0x11af   : > { %v1553_v50 = vadd.f32 1.0, %v3023_v44 }
0x11b1   : > { %3024 = vrcp.f32 %v1553_v50 }
0x11bb   : > { %v3025_v46 = vpop.eup %3024 }
0x11bc   : > { %v1557_v27 = vmul.f32 %v3025_v46, %v1468_v23 }
0x121f   : > { %v1560_v51 = vpop.permute.xlu0 %1559 }
0x1220   : > { %v1562_v0 = vmul.f32 %v3025_v46, %v1560_v51 }
0x1222   : > { %1564 = vrot.lane.b32.xlu1 %v1562_v0, %s3105_s6 }
0x1294   : > { %v1565_v28 = vpop.permute.xlu1 %1564 }
0x1295   : > { %v1567_v55 = vadd.f32 %v1565_v28, %v1557_v27 }
0x1297   : > { %3026 = vtanh.f32 %v1567_v55 }
0x12a1   : > { %v3027_v29 = vpop.eup %3026 }
0x12a2   : > { %1570 = vrot.lane.b32.xlu0 %v3027_v29, %s3103_s10 }
0x1314   : > { %v1571_v56 = vpop.permute.xlu0 %1570 }
0x1315   : > { %v3557_v58 = vmul.f32 %v3025_v46, %v1571_v56 }
0x1317   : > { %1576 = vrot.lane.b32.xlu1 %v3557_v58, %s3105_s6 }
0x1389   : > { %v1577_v59 = vpop.permute.xlu1 %1576 }
0x138a   : > { %2645 = vmatmul.mubr.msk.f32.vlgmr.msra.gmra.mrb[22].mxu0 %vm326_vm6, %v1577_v59 }
0x138b   : > { %2873 = vmatpush3.bf16.msra.mxu0 %v3521_v12  ;;  %2655 = vmatprep.mubr.msk.f32.mxu0 %vm3102_vm8, %v3101_v16 }
0x138c   : > { %2874 = vmatprep.subr.bf16.mxu0 %v3104_v47 }
0x138f   : > { %2876 = vmatpush3.bf16.msra.mxu0 %v3537_v26 }
0x1390   : > { %2883 = vmatprep.subr.bf16.mxu0 %v3104_v47 }
0x145d   : > { %v1646_v54 = vpop.f32.mrb[22].mxu0 }
0x145e   : > { %v1650_v60 = vadd.f32 %v1646_v54, %v3322_v31  ;;  %v2646_v61 = vpop.f32.mrb[23].mxu0 }
0x1460   : > { %3028 = vtanh.f32 %v1650_v60  ;;  %v2498_v63 = vmul.f32 -1.442695, %v1650_v60 }
0x1462   : > { %3030 = vpow2.f32 %v2498_v63 }
0x146a   : > { %v3029_v57 = vpop.eup %3028 }
0x146b   : > { %1660 = vrot.lane.b32.xlu0 %v3029_v57, %s3103_s10 }
0x146c   : > { %v3031_v2 = vpop.eup %3030 }
0x146d   : > { %v1654_v62 = vadd.f32 1.0, %v3031_v2 }
0x146f   : > { %3032 = vrcp.f32 %v1654_v62 }
0x1479   : > { %v3033_v10 = vpop.eup %3032 }
0x147a   : > { %v1658_v1 = vmul.f32 %v3033_v10, %v1567_v55 }
0x14dd   : > { %v1661_v13 = vpop.permute.xlu0 %1660 }
0x14de   : > { %v1663_v19 = vmul.f32 %v3033_v10, %v1661_v13 }
0x14e0   : > { %1665 = vrot.lane.b32.xlu1 %v1663_v19, %s3105_s6 }
0x1552   : > { %v1666_v52 = vpop.permute.xlu1 %1665 }
0x1553   : > { %v1668_v3 = vadd.f32 %v1666_v52, %v1658_v1 }
0x1555   : > { %3034 = vtanh.f32 %v1668_v3 }
0x155f   : > { %v3035_v31 = vpop.eup %3034 }
0x1560   : > { %1671 = vrot.lane.b32.xlu0 %v3035_v31, %s3103_s10 }
0x15d2   : > { %v1672_v53 = vpop.permute.xlu0 %1671 }
0x15d3   : > { %v3572_v4 = vmul.f32 %v3033_v10, %v1672_v53 }
0x15d5   : > { %1677 = vrot.lane.b32.xlu1 %v3572_v4, %s3105_s6 }
0x1647   : > { %v1678_v5 = vpop.permute.xlu1 %1677 }
0x1648   : > { %2656 = vmatmul.mubr.msk.f32.vlgmr.msra.gmra.mrb[24].mxu0 %vm326_vm6, %v1678_v5 }
0x1649   : > { %2885 = vmatpush3.bf16.msra.mxu0 %v3521_v12  ;;  %2677 = vmatprep.mubr.msk.f32.mxu0 %vm3102_vm8, %v3101_v16 }
0x164a   : > { %2886 = vmatprep.subr.bf16.mxu0 %v3104_v47 }
0x164d   : > { %2888 = vmatpush3.bf16.msra.mxu0 %v3537_v26 }
0x164e   : > { %2691 = vmatprep.subr.bf16.mxu0 %v3101_v16 }
0x171b   : > { %v1747_v6 = vpop.f32.mrb[24].mxu0 }
0x171c   : > { %v1751_v7 = vadd.f32 %v1747_v6, %v3324_v35  ;;  %v2657_v41 = vpop.f32.mrb[25].mxu0 }
0x171e   : > { %3036 = vtanh.f32 %v1751_v7  ;;  %v2500_v8 = vmul.f32 -1.442695, %v1751_v7 }
0x1720   : > { %3038 = vpow2.f32 %v2500_v8  ;;  %v2084_v8 = vpack.c.bf16 %v3572_v4, %v3557_v58 }
0x1728   : > { %v3037_v25 = vpop.eup %3036 }
0x1729   : > { %1761 = vrot.lane.b32.xlu0 %v3037_v25, %s3103_s10 }
0x172a   : > { %v3039_v11 = vpop.eup %3038 }
0x172b   : > { %v1755_v48 = vadd.f32 1.0, %v3039_v11 }
0x172d   : > { %3040 = vrcp.f32 %v1755_v48 }
0x1737   : > { %v3041_v42 = vpop.eup %3040 }
0x1738   : > { %v1759_v15 = vmul.f32 %v3041_v42, %v1668_v3  ;;  %v2922_v3 = vld [vmem:[%s3757_s1 + $0x30] ss:$8 sps:$4 sm:$0xff]  }
0x179b   : > { %v1762_v49 = vpop.permute.xlu0 %1761 }
0x179c   : > { %v1764_v14 = vmul.f32 %v3041_v42, %v1762_v49 }
0x179e   : > { %1766 = vrot.lane.b32.xlu1 %v1764_v14, %s3105_s6 }
0x1810   : > { %v1767_v9 = vpop.permute.xlu1 %1766 }
0x1811   : > { %v1769_v17 = vadd.f32 %v1767_v9, %v1759_v15 }
0x1813   : > { %3042 = vtanh.f32 %v1769_v17 }
0x181d   : > { %v3043_v35 = vpop.eup %3042 }
0x181e   : > { %1772 = vrot.lane.b32.xlu0 %v3043_v35, %s3103_s10  ;;  %v2083_v35 = vld [vmem:[%s3758_s2 + $0x1d0] ss:$0 sm:$0xff] }
0x1890   : > { %v1773_v18 = vpop.permute.xlu0 %1772 }
0x1891   : > { %v3587_v24 = vmul.f32 %v3041_v42, %v1773_v18 }
0x1893   : > { %1778 = vrot.lane.b32.xlu1 %v3587_v24, %s3105_s6 }
0x1905   : > { %v1779_v20 = vpop.permute.xlu1 %1778 }
0x1906   : > { %2667 = vmatmul.mubr.msk.f32.vlgmr.msra.gmra.mrb[26].mxu1 %vm326_vm6, %v1779_v20 }
0x1907   : > { %2891 = vmatpush3.bf16.msra.mxu1 %v3521_v12  ;;  %2688 = vmatprep.mubr.msk.f32.mxu1 %vm3102_vm8, %v3101_v16 }
0x1908   : > { %2892 = vmatprep.subr.bf16.mxu1 %v3104_v47 }
0x190b   : > { %2894 = vmatpush3.bf16.msra.mxu1 %v3537_v26 }
0x19d9   : > { %v1848_v21 = vpop.f32.mrb[26].mxu1 }
0x19da   : > { %v1852_v22 = vadd.f32 %v1848_v21, %v3326_v37  ;;  %v2668_v23 = vpop.f32.mrb[27].mxu1 }
0x19dc   : > { %3044 = vtanh.f32 %v1852_v22  ;;  %v2502_v32 = vmul.f32 -1.442695, %v1852_v22 }
0x19de   : > { %3046 = vpow2.f32 %v2502_v32 }
0x19e6   : > { %v3045_v30 = vpop.eup %3044 }
0x19e7   : > { %1862 = vrot.lane.b32.xlu0 %v3045_v30, %s3103_s10 }
0x19e8   : > { %v3047_v36 = vpop.eup %3046 }
0x19e9   : > { %v1856_v38 = vadd.f32 1.0, %v3047_v36 }
0x19eb   : > { %3048 = vrcp.f32 %v1856_v38 }
0x19f5   : > { %v3049_v12 = vpop.eup %3048 }
0x19f6   : > { %v1860_v47 = vmul.f32 %v3049_v12, %v1769_v17 }
0x1a59   : > { %v1863_v39 = vpop.permute.xlu0 %1862 }
0x1a5a   : > { %v1865_v40 = vmul.f32 %v3049_v12, %v1863_v39 }
0x1a5c   : > { %1867 = vrot.lane.b32.xlu1 %v1865_v40, %s3105_s6 }
0x1ace   : > { %v1868_v26 = vpop.permute.xlu1 %1867 }
0x1acf   : > { %v1870_v44 = vadd.f32 %v1868_v26, %v1860_v47 }
0x1ad1   : > { %3050 = vtanh.f32 %v1870_v44 }
0x1adb   : > { %v3051_v37 = vpop.eup %3050 }
0x1adc   : > { %1873 = vrot.lane.b32.xlu0 %v3051_v37, %s3103_s10 }
0x1b4e   : > { %v1874_v50 = vpop.permute.xlu0 %1873 }
0x1b4f   : > { %v3601_v46 = vmul.f32 %v3049_v12, %v1874_v50 }
0x1b51   : > { %1879 = vrot.lane.b32.xlu1 %v3601_v46, %s3105_s6  ;;  %v2085_v15 = vpack.c.bf16 %v3601_v46, %v3587_v24 }
0x1bc3   : > { %v1880_v51 = vpop.permute.xlu1 %1879 }
0x1bc4   : > { %2678 = vmatmul.mubr.msk.f32.vlgmr.msra.gmra.mrb[26].mxu0 %vm326_vm6, %v1880_v51 }
0x1bc5   : > { %2695 = vmatprep.mubr.msk.bf16.mxu0 %vm3102_vm8, %v3101_v16  ;;  %2692 = vmatpush3.bf16.msra.mxu0 %v2922_v3 }
0x1bc6   : > { %2693 = vmatprep.subr.bf16.mxu0 %v3101_v16 }
0x1c97   : > { %v1949_v0 = vpop.f32.mrb[26].mxu0 }
0x1c98   : > { %v1953_v27 = vadd.f32 %v1949_v0, %v3332_v43  ;;  %v2679_v28 = vpop.f32.mrb[27].mxu0 }
0x1c9a   : > { %3052 = vtanh.f32 %v1953_v27  ;;  %v2504_v29 = vmul.f32 -1.442695, %v1953_v27 }
0x1c9c   : > { %3054 = vpow2.f32 %v2504_v29 }
0x1ca4   : > { %v3053_v55 = vpop.eup %3052 }
0x1ca5   : > { %1963 = vrot.lane.b32.xlu0 %v3053_v55, %s3103_s10 }
0x1ca6   : > { %v3055_v56 = vpop.eup %3054 }
0x1ca7   : > { %v1957_v59 = vadd.f32 1.0, %v3055_v56 }
0x1ca9   : > { %3056 = vrcp.f32 %v1957_v59 }
0x1cb3   : > { %v3057_v54 = vpop.eup %3056 }
0x1cb4   : > { %v1961_v57 = vmul.f32 %v3057_v54, %v1870_v44 }
0x1d17   : > { %v1964_v60 = vpop.permute.xlu0 %1963 }
0x1d18   : > { %v1966_v61 = vmul.f32 %v3057_v54, %v1964_v60 }
0x1d1a   : > { %1968 = vrot.lane.b32.xlu1 %v1966_v61, %s3105_s6 }
0x1d8c   : > { %v1969_v63 = vpop.permute.xlu1 %1968 }
0x1d8d   : > { %v1971_v2 = vadd.f32 %v1969_v63, %v1961_v57 }
0x1d8f   : > { %3058 = vtanh.f32 %v1971_v2 }
0x1d99   : > { %v3059_v43 = vpop.eup %3058 }
0x1d9a   : > { %1974 = vrot.lane.b32.xlu0 %v3059_v43, %s3103_s10 }
0x1e0c   : > { %v1975_v62 = vpop.permute.xlu0 %1974 }
0x1e0d   : > { %v1977_v10 = vmul.f32 %v3057_v54, %v1975_v62 }
0x1e0f   : > { %1980 = vrot.lane.b32.xlu1 %v1977_v10, %s3105_s6 }
0x1e81   : > { %v1981_v13 = vpop.permute.xlu1 %1980 }
0x1e82   : > { %2689 = vmatmul.mubr.msk.f32.vlgmr.msra.gmra.mrb[28].mxu1 %vm326_vm6, %v1981_v13  ;;  %v3678_v13 = vld [vmem:[%s3144_s18 + $0xc0] sm:$0xff] }
0x1e83   : > { %vm2284_vm12 = vcmp.ne.s32.totalorder %v3678_v13, 0 }
0x1f55   : > { %v2050_v19 = vpop.f32.mrb[28].mxu1 }
0x1f56   : > { %v2054_v1 = vadd.f32 %v2050_v19, %v3334_v45  ;;  %v2690_v52 = vpop.f32.mrb[29].mxu1  ;;  %v2923_v45 = vld [vmem:[%s3757_s1 + $0x40] ss:$8 sps:$4 sm:$0xff]  }
0x1f57   : > { %2694 = vmatpush3.bf16.msra.mxu0 %v2923_v45  ;;  %v3682_v19 = vld [vmem:[%s3144_s18 + $0xc8] sm:$0xff] }
0x1f58   : > { %3060 = vtanh.f32 %v2054_v1  ;;  %v2506_v53 = vmul.f32 -1.442695, %v2054_v1  ;;  %v3685_v1 = vld [vmem:[%s3144_s18 + $0xb8] sm:$0xff]  ;;  %vm2285_vm13 = vcmp.ne.s32.totalorder %v3682_v19, 0 }
0x1f59   : > { %vm2283_vm10 = vcmp.ne.s32.totalorder %v3685_v1, 0 }
0x1f5a   : > { %3062 = vpow2.f32 %v2506_v53 }
0x1f62   : > { %v3061_v31 = vpop.eup %3060 }
0x1f63   : > { %2064 = vrot.lane.b32.xlu0 %v3061_v31, %s3103_s10 }
0x1f64   : > { %v3063_v5 = vpop.eup %3062 }
0x1f65   : > { %v2058_v6 = vadd.f32 1.0, %v3063_v5 }
0x1f67   : > { %3064 = vrcp.f32 %v2058_v6 }
0x1f71   : > { %v3065_v7 = vpop.eup %3064 }
0x1f72   : > { %v2062_v11 = vmul.f32 %v3065_v7, %v1971_v2 }
0x1fd5   : > { %v2065_v41 = vpop.permute.xlu0 %2064 }
0x1fd6   : > { %v2067_v25 = vmul.f32 %v3065_v7, %v2065_v41  ;;  %v3698_v41 = vld [vmem:[%s3144_s18 + $0xd8] sm:$0xff] }
0x1fd7   : > { %vm2287_vm15 = vcmp.ne.s32.totalorder %v3698_v41, 0 }
0x1fd8   : > { %2069 = vrot.lane.b32.xlu1 %v2067_v25, %s3105_s6  ;;  %v3702_v25 = vld [vmem:[%s3144_s18 + $0xd0] sm:$0xff] }
0x1fd9   : > { %vm2286_vm14 = vcmp.ne.s32.totalorder %v3702_v25, 0 }
0x1fdc   : > { %2090 = vrot.lane.b32.xlu1 %v2084_v8, %s3105_s6 }
0x204a   : > { %v2070_v48 = vpop.permute.xlu1 %2069 }
0x204b   : > { %v2072_v42 = vadd.f32 %v2070_v48, %v2062_v11 }
0x204d   : > { %3066 = vtanh.f32 %v2072_v42 }
0x204e   : > { %v2091_v49 = vpop.permute.xlu1 %2090 }
0x204f   : > { %2696 = vmatmul.mubr.msk.bf16.vlgmr.msra.gmra.mrb[28].mxu0 %vm326_vm6, %v2091_v49 }
0x2050   : > { %2699 = vmatprep.mubr.msk.bf16.mxu0 %vm3102_vm8, %v3101_v16 }
0x2057   : > { %v3067_v14 = vpop.eup %3066 }
0x2058   : > { %2075 = vrot.lane.b32.xlu0 %v3067_v14, %s3103_s10 }
0x205c   : > { %2092 = vrot.lane.b32.xlu0 %v2085_v15, %s3105_s6 }
0x20ca   : > { %v2076_v58 = vpop.permute.xlu0 %2075 }
0x20cb   : > { %v2078_v4 = vmul.f32 %v3065_v7, %v2076_v58 }
0x20cd   : > { %v2086_v9 = vpack.c.bf16 %v2078_v4, %v1977_v10  ;;  %v3674_v10 = vld [vmem:[%s3144_s18 + $0xb0] sm:$0xff]  ;;  %s2445_s18 = sshll.u32 %s3763_s13, 3 }
0x20ce   : > { %v2093_v17 = vpop.permute.xlu0 %2092  ;;  %vm2282_vm11 = vcmp.ne.s32.totalorder %v3674_v10, 0  ;;  %s170_s17 = scalar_lea.vmem %s3759_s3, %s2445_s18 }
0x20cf   : > { %2094 = vrot.lane.b32.xlu1 %v2086_v9, %s3105_s6  ;;  %2700 = vmatmul.mubr.msk.bf16.gmra.mrb[32].mxu0 %vm326_vm6, %v2093_v17 }
0x20d0   : > { %2703 = vmatprep.mubr.msk.bf16.mxu0 %vm3102_vm8, %v3101_v16 }
0x2122   : > { %v2151_v18 = vpop.f32.mrb[28].mxu0 }
0x2123   : > { %v3641_v20 = vadd.f32 %v2151_v18, %v2083_v35  ;;  %v2697_v24 = vpop.f32.mrb[29].mxu0 }
0x2124   : > { %v2154_v21 = vpop.f32.mrb[30].mxu0 }
0x2125   : > { %v3643_v22 = vadd.f32 %v2154_v21, %v2083_v35  ;;  %v2698_v23 = vpop.f32.mrb[31].mxu0  ;;  %2174 = vmax.xlane.f32.xlu0 %v3641_v20 }
0x2127   : > { %2176 = vmax.xlane.f32.xlu1 %v3643_v22 }
0x2141   : > { %v2095_v30 = vpop.permute.xlu1 %2094 }
0x2142   : > { %2704 = vmatmul.mubr.msk.bf16.gmra.mrb[36].mxu0 %vm326_vm6, %v2095_v30 }
0x21a2   : > { %v2159_v32 = vpop.f32.mrb[32].mxu0 }
0x21a3   : > { %v3648_v36 = vadd.f32 %v2159_v32, %v2083_v35  ;;  %v2701_v38 = vpop.f32.mrb[33].mxu0 }
0x21a4   : > { %v2162_v12 = vpop.f32.mrb[34].mxu0 }
0x21a5   : > { %2178 = vmax.xlane.f32.xlu0 %v3648_v36  ;;  %v2702_v39 = vpop.f32.mrb[35].mxu0  ;;  %v3651_v40 = vadd.f32 %v2162_v12, %v2083_v35 }
0x21a9   : > { %2180 = vmax.xlane.f32.xlu0 %v3651_v40 }
0x21b2   : > { %v3654_v47 = vpop.xlane.xlu0 %2174 }
0x21b3   : > { %v2186_v44 = vsub.f32 %v3641_v20, %v3654_v47 }
0x21b4   : > { %v3656_v26 = vpop.xlane.xlu1 %2176 }
0x21b5   : > { %v2187_v37 = vsub.f32 %v3643_v22, %v3656_v26  ;;  %v2192_v50 = vmul.f32 1.442695, %v2186_v44 }
0x21b7   : > { %v2194_v46 = vmul.f32 1.442695, %v2187_v37  ;;  %3068 = vpow2.f32 %v2192_v50 }
0x21b9   : > { %3070 = vpow2.f32 %v2194_v46 }
0x21c1   : > { %v3069_v56 = vpop.eup %3068 }
0x21c3   : > { %v3071_v59 = vpop.eup %3070 }
0x2215   : > { %v2167_v51 = vpop.f32.mrb[36].mxu0 }
0x2216   : > { %v3662_v0 = vadd.f32 %v2167_v51, %v2083_v35  ;;  %v2705_v27 = vpop.f32.mrb[37].mxu0 }
0x2217   : > { %v2170_v28 = vpop.f32.mrb[38].mxu0 }
0x2218   : > { %v3664_v55 = vadd.f32 %v2170_v28, %v2083_v35  ;;  %2182 = vmax.xlane.f32.xlu1 %v3662_v0  ;;  %v2706_v29 = vpop.f32.mrb[39].mxu0 }
0x221a   : > { %2184 = vmax.xlane.f32.xlu0 %v3664_v55 }
0x221c   : > { %2204 = vadd.xlane.f32.xlu1 %v3069_v56 }
0x221e   : > { %2206 = vadd.xlane.f32.xlu0 %v3071_v59 }
0x2232   : > { %v2179_v54 = vpop.xlane.xlu0 %2178 }
0x2233   : > { %v2188_v60 = vsub.f32 %v3648_v36, %v2179_v54 }
0x2235   : > { %v2196_v61 = vmul.f32 1.442695, %v2188_v60 }
0x2236   : > { %v3669_v57 = vpop.xlane.xlu0 %2180 }
0x2237   : > { %3072 = vpow2.f32 %v2196_v61  ;;  %v2189_v63 = vsub.f32 %v3651_v40, %v3669_v57 }
0x2239   : > { %v2198_v2 = vmul.f32 1.442695, %v2189_v63 }
0x223b   : > { %3074 = vpow2.f32 %v2198_v2 }
0x2241   : > { %v3073_v43 = vpop.eup %3072 }
0x2242   : > { %2208 = vadd.xlane.f32.xlu1 %v3073_v43 }
0x2245   : > { %v3075_v62 = vpop.eup %3074 }
0x2246   : > { %2210 = vadd.xlane.f32.xlu0 %v3075_v62 }
0x2253   : > { %2241 = vperm.xlu1 %2914, %v3674_v10  }
0x2257   : > { %2247 = vperm.xlu1 %2914, %v3678_v13  }
0x225b   : > { %2250 = vperm.xlu1 %2914, %v3682_v19  }
0x225c   : > { %2244 = vperm.xlu0 %2913, %v3685_v1  }
0x22a5   : > { %v3689_v52 = vpop.xlane.xlu1 %2182 }
0x22a6   : > { %v2190_v3 = vsub.f32 %v3662_v0, %v3689_v52 }
0x22a7   : > { %v3693_v31 = vpop.xlane.xlu0 %2184 }
0x22a8   : > { %v2200_v53 = vmul.f32 1.442695, %v2190_v3  ;;  %v2191_v5 = vsub.f32 %v3664_v55, %v3693_v31 }
0x22a9   : > { %v2205_v8 = vpop.xlane.xlu1 %2204 }
0x22aa   : > { %3076 = vpow2.f32 %v2200_v53  ;;  %v2202_v6 = vmul.f32 1.442695, %v2191_v5 }
0x22ab   : > { %v2207_v11 = vpop.xlane.xlu0 %2206 }
0x22ac   : > { %3078 = vpow2.f32 %v2202_v6 }
0x22ad   : > { %3080 = vlog2.f32 %v2207_v11 }
0x22ae   : > { %3082 = vlog2.f32 %v2205_v8 }
0x22b4   : > { %v3077_v45 = vpop.eup %3076 }
0x22b5   : > { %2212 = vadd.xlane.f32.xlu1 %v3077_v45 }
0x22b6   : > { %v3079_v7 = vpop.eup %3078 }
0x22b7   : > { %2214 = vadd.xlane.f32.xlu0 %v3079_v7  ;;  %v3081_v49 = vpop.eup %3080 }
0x22b8   : > { %v3083_v14 = vpop.eup %3082  ;;  %v2219_v15 = vmul.f32 0.6931472, %v3081_v49 }
0x22b9   : > { %v2217_v4 = vmul.f32 0.6931472, %v3083_v14 }
0x22ba   : > { %v2229_v18 = vadd.f32 %v2219_v15, %v3656_v26 }
0x22bb   : > { %v2228_v21 = vadd.f32 %v2217_v4, %v3654_v47 }
0x22bc   : > { %v2235_v30 = vsub.f32 %v3643_v22, %v2229_v18 }
0x22bd   : > { %v2234_v39 = vsub.f32 %v3641_v20, %v2228_v21 }
0x22c6   : > { %2256 = vperm.xlu1 %2914, %v3698_v41  }
0x22cd   : > { %2253 = vperm.xlu0 %2913, %v3702_v25  }
0x22cf   : > { %v2209_v48 = vpop.xlane.xlu1 %2208 }
0x22d0   : > { %3084 = vlog2.f32 %v2209_v48  ;;  %v2301_v48 = vshrl.u32 %v200_v33, 7 }
0x22d2   : > { %v2303_v49 = vadd.s32 16, %v2301_v48  ;;  %v2307_v14 = vand.u32 7, %v2301_v48  ;;  %v2304_v15 = vadd.s32 24, %v2301_v48  ;;  %v2305_v41 = vadd.s32 32, %v2301_v48 }
0x22d3   : > { %v2211_v42 = vpop.xlane.xlu0 %2210  ;;  %v2242_v17 = vpop.permute.xlu1 %2241  ;;  %v2306_v33 = vadd.s32 40, %v2301_v48 }
0x22d4   : > { %3086 = vlog2.f32 %v2211_v42  ;;  %vm2258_vm8 = vcmp.eq.s32.totalorder %v3187_v34, %v2242_v17  ;;  %v2302_v42 = vadd.s32 8, %v2301_v48  ;;  %v2309_v4 = vand.u32 7, %v2303_v49 }
0x22d5   : > { %v2264_v44 = vsel %vm2258_vm8, %v2234_v39, 0.0  ;;  %vm2313_vm0 = vcmp.eq.s32.totalorder %v2307_v14, %v3187_v34  ;;  %v2310_v25 = vand.u32 7, %v2304_v15  ;;  %v2312_v39 = vand.u32 7, %v2306_v33 }
0x22d6   : > { %vm2315_vm2 = vcmp.eq.s32.totalorder %v2309_v4, %v3187_v34  ;;  %v2512_v17 = vsel %vm2313_vm0, 1.0, %v3101_v16 }
0x22d7   : > { %v2248_v38 = vpop.permute.xlu1 %2247  ;;  %vm2316_vm3 = vcmp.eq.s32.totalorder %v2310_v25, %v3187_v34 }
0x22d8   : > { %vm2260_vm4 = vcmp.eq.s32.totalorder %v3187_v34, %v2248_v38 }
0x22da   : > { %v3085_v58 = vpop.eup %3084 }
0x22db   : > { %v2221_v9 = vmul.f32 0.6931472, %v3085_v58  ;;  %v2245_v35 = vpop.permute.xlu0 %2244  ;;  %v2251_v47 = vpop.permute.xlu1 %2250  ;;  %v2308_v58 = vand.u32 7, %v2302_v42 }
0x22dc   : > { %vm2259_vm6 = vcmp.eq.s32.totalorder %v3187_v34, %v2245_v35  ;;  %vm2261_vm5 = vcmp.eq.s32.totalorder %v3187_v34, %v2251_v47 }
0x22dd   : > { %v2230_v32 = vadd.f32 %v2221_v9, %v2179_v54  ;;  %v2265_v12 = vsel %vm2259_vm6, %v2235_v30, 0.0  ;;  %vm2314_vm1 = vcmp.eq.s32.totalorder %v2308_v58, %v3187_v34  ;;  %v2515_v30 = vsel %vm2316_vm3, 1.0, %v3101_v16 }
0x22de   : > { %v3087_v24 = vpop.eup %3086  ;;  %v2513_v35 = vsel %vm2314_vm1, 1.0, %v3101_v16  ;;  %vm2367_vm6 = vcmask 64512  }
0x22df   : > { %v2223_v23 = vmul.f32 0.6931472, %v3087_v24  ;;  %v2236_v37 = vsub.f32 %v3648_v36, %v2230_v32  ;;  %v2514_v24 = vsel %vm2315_vm2, 1.0, %v3101_v16 }
0x22e1   : > { %v2231_v26 = vadd.f32 %v2223_v23, %v3669_v57  ;;  %v2266_v50 = vsel %vm2260_vm4, %v2236_v37, 0.0  ;;  %v2311_v23 = vand.u32 7, %v2305_v41  ;;  %vm2318_vm4 = vcmp.eq.s32.totalorder %v2312_v39, %v3187_v34 }
0x22e3   : > { %v2237_v22 = vsub.f32 %v3651_v40, %v2231_v26  ;;  %vm2317_vm8 = vcmp.eq.s32.totalorder %v2311_v23, %v3187_v34 }
0x22e5   : > { %v2267_v46 = vsel %vm2261_vm5, %v2237_v22, 0.0  ;;  %v2516_v22 = vsel %vm2317_vm8, 1.0, %v3101_v16 }
0x22ea   : > { %2272 = vadd.xlane.f32.xlu1 %v2265_v12 }
0x22ec   : > { %2270 = vadd.xlane.f32.xlu0 %v2264_v44 }
0x22f0   : > { %2274 = vadd.xlane.f32.xlu0 %v2266_v50 }
0x22f4   : > { %2276 = vadd.xlane.f32.xlu0 %v2267_v46 }
0x2342   : > { %v2213_v51 = vpop.xlane.xlu1 %2212 }
0x2343   : > { %3088 = vlog2.f32 %v2213_v51 }
0x2344   : > { %v2215_v20 = vpop.xlane.xlu0 %2214 }
0x2345   : > { %3090 = vlog2.f32 %v2215_v20 }
0x2346   : > { %v2257_v54 = vpop.permute.xlu1 %2256 }
0x2347   : > { %vm2263_vm9 = vcmp.eq.s32.totalorder %v3187_v34, %v2257_v54 }
0x234c   : > { %v2254_v56 = vpop.permute.xlu0 %2253 }
0x234d   : > { %v3089_v27 = vpop.eup %3088  ;;  %vm2262_vm7 = vcmp.eq.s32.totalorder %v3187_v34, %v2254_v56 }
0x234e   : > { %v2225_v36 = vmul.f32 0.6931472, %v3089_v27  ;;  %v2517_v27 = vsel %vm2318_vm4, 1.0, %v3101_v16 }
0x234f   : > { %v3091_v28 = vpop.eup %3090 }
0x2350   : > { %v2227_v29 = vmul.f32 0.6931472, %v3091_v28  ;;  %v2232_v59 = vadd.f32 %v2225_v36, %v3689_v52 }
0x2352   : > { %v2238_v60 = vsub.f32 %v3662_v0, %v2232_v59  ;;  %v2233_v40 = vadd.f32 %v2227_v29, %v3693_v31 }
0x2354   : > { %v2268_v61 = vsel %vm2262_vm7, %v2238_v60, 0.0  ;;  %v2239_v57 = vsub.f32 %v3664_v55, %v2233_v40 }
0x2355   : > { %2278 = vadd.xlane.f32.xlu1 %v2268_v61 }
0x2356   : > { %v2269_v63 = vsel %vm2263_vm9, %v2239_v57, 0.0 }
0x2357   : > { %2280 = vadd.xlane.f32.xlu0 %v2269_v63 }
0x2377   : > { %v2273_v2 = vpop.xlane.xlu1 %2272 }
0x2378   : > { %v2289_v43 = vsub.f32 0.0, %v2273_v2 }
0x2379   : > { %v2271_v62 = vpop.xlane.xlu0 %2270 }
0x237a   : > { %v2288_v0 = vsub.f32 0.0, %v2271_v62  ;;  %v2295_v52 = vsel %vm2283_vm10, %v2289_v43, 0.0 }
0x237b   : > { %2338 = vperm.xlu0 %2913, %v2295_v52  }
0x237c   : > { %v2294_v3 = vsel %vm2282_vm11, %v2288_v0, 0.0 }
0x237d   : > { %2333 = vperm.xlu1 %2914, %v2294_v3   ;;  %v2275_v31 = vpop.xlane.xlu0 %2274 }
0x237e   : > { %v2290_v55 = vsub.f32 0.0, %v2275_v31 }
0x2380   : > { %v2296_v53 = vsel %vm2284_vm12, %v2290_v55, 0.0 }
0x2381   : > { %2343 = vperm.xlu1 %2914, %v2296_v53   ;;  %v2277_v5 = vpop.xlane.xlu0 %2276 }
0x2382   : > { %v2291_v6 = vsub.f32 0.0, %v2277_v5 }
0x2384   : > { %v2297_v1 = vsel %vm2285_vm13, %v2291_v6, 0.0 }
0x2385   : > { %2348 = vperm.xlu1 %2914, %v2297_v1  }
0x23e2   : > { %v2279_v45 = vpop.xlane.xlu1 %2278 }
0x23e3   : > { %v2292_v10 = vsub.f32 0.0, %v2279_v45 }
0x23e4   : > { %v2281_v7 = vpop.xlane.xlu0 %2280 }
0x23e5   : > { %v2293_v8 = vsub.f32 0.0, %v2281_v7  ;;  %v2298_v11 = vsel %vm2286_vm14, %v2292_v10, 0.0 }
0x23e6   : > { %2353 = vperm.xlu0 %2913, %v2298_v11  }
0x23e7   : > { %v2299_v13 = vsel %vm2287_vm15, %v2293_v8, 0.0 }
0x23e8   : > { %2358 = vperm.xlu1 %2914, %v2299_v13  }
0x23fa   : > { %v2339_v18 = vpop.permute.xlu0 %2338 }
0x23fb   : > { %v2362_v38 = vmul.f32 %v2513_v35, %v2339_v18 }
0x23fc   : > { %v2334_v19 = vpop.permute.xlu1 %2333 }
0x23fd   : > { %v2361_v21 = vmul.f32 %v2512_v17, %v2334_v19  ;;  %v2369_v26 = vsel %vm2367_vm6, %v2362_v38, 0.0 }
0x23ff   : > { %v2368_v44 = vsel %vm2367_vm6, %v2361_v21, 0.0 }
0x2400   : > { %v2344_v9 = vpop.permute.xlu1 %2343  ;;  %v2370_v50 = vadd.f32 %v2369_v26, %v2368_v44 }
0x2401   : > { %v2363_v12 = vmul.f32 %v2514_v24, %v2344_v9 }
0x2403   : > { %v2371_v47 = vsel %vm2367_vm6, %v2363_v12, 0.0 }
0x2404   : > { %v2349_v32 = vpop.permute.xlu1 %2348  ;;  %v2372_v51 = vadd.f32 %v2371_v47, %v2370_v50 }
0x2405   : > { %v2364_v37 = vmul.f32 %v2515_v30, %v2349_v32 }
0x2407   : > { %v2373_v46 = vsel %vm2367_vm6, %v2364_v37, 0.0 }
0x2408   : > { %v2374_v28 = vadd.f32 %v2373_v46, %v2372_v51 }
0x2465   : > { %v2354_v20 = vpop.permute.xlu0 %2353 }
0x2466   : > { %v2365_v36 = vmul.f32 %v2516_v22, %v2354_v20 }
0x2467   : > { %v2359_v29 = vpop.permute.xlu1 %2358 }
0x2468   : > { %v2375_v56 = vsel %vm2367_vm6, %v2365_v36, 0.0  ;;  %v2366_v59 = vmul.f32 %v2517_v27, %v2359_v29 }
0x2469   : > { %v2376_v54 = vadd.f32 %v2375_v56, %v2374_v28 }
0x246a   : > { %v2377_v60 = vsel %vm2367_vm6, %v2366_v59, 0.0 }
0x246b   : > { %v2378_v34 = vadd.f32 %v2377_v60, %v2376_v54 }
0x246d   : > { %v2379_v40 = vrot.slane %v2378_v34, 4 }
0x246f   : > { %v2380_v61 = vadd.f32 %v2379_v40, %v2378_v34 }
0x2471   : > { %v2381_v57 = vrot.slane %v2380_v61, 2 }
0x2473   : > { %v2382_v63 = vadd.f32 %v2381_v57, %v2380_v61 }
0x2475   : > { %v2383_v2 = vrot.slane %v2382_v63, 1 }
0x2477   : > { %v2384_v16 = vadd.f32 %v2383_v2, %v2382_v63 }
0x2479   : > { %2385 = vst.msk [vmem:[%s170_s17] sm:$0xff] %vm2367_vm6, %v2384_v16 }
0x247a PF: > { %s13_s12 = sadd.s32 1, %s3098_s12  }
0x247b   : > { %p10_p5 = scmp.ge.s32.totalorder %s13_s12, 4  }
0x247d   :  { %12 = sbr.rel (!%p10_p5) target bundleno = 1 (0x1), region = 62 }

</bundles_post_ra>
